<compile_context>
chip_gen: v6e
topology: v6e:2x2x1
jax: 0.10.0
libtpu: 0.0.40
codegen_flags: <defaults>
</compile_context>

<pallas_src>
import functools
import math

import jax
import jax.numpy as jnp
from jax.experimental import pallas as pl
from jax.experimental.pallas import tpu as pltpu


# ---------------------------------------------------------------------------
# helpers
# ---------------------------------------------------------------------------

def _pick_tile(dim: int, target: int, align: int = 1) -> int:
    """Largest tile <= target that divides `dim` and is a multiple of `align`.

    Falls back to the full dimension, which is always a legal block shape
    (block == full array dim satisfies the (8,128) divisibility rule)."""
    if dim <= target:
        return dim
    t = (min(target, dim) // align) * align
    while t >= align:
        if dim % t == 0:
            return t
        t -= align
    return dim


def _lcm(a: int, b: int) -> int:
    return a * b // math.gcd(a, b)


# ---------------------------------------------------------------------------
# Fused QKV projection with RoPE epilogue
# ---------------------------------------------------------------------------

def _qkv_rope_kernel(x_ref, w_ref, b_ref, cos_ref, sin_ref, o_ref, acc_ref,
                     *, d_k, mxu_dtype):
    p = pl.program_id(2)                     # 0=Q, 1=K, 2=V
    k = pl.program_id(3)
    last = k == pl.num_programs(3) - 1

    @pl.when(k == 0)
    def _():
        acc_ref[...] = jnp.zeros_like(acc_ref)

    acc_ref[...] += jnp.dot(x_ref[...].astype(mxu_dtype),
                            w_ref[...].astype(mxu_dtype),
                            preferred_element_type=jnp.float32)

    # Q / K rows: add bias, apply RoPE (sign folded into sin; 1/sqrt(d_k)
    # already folded into the Q weights in the wrapper).
    @pl.when(last & (p <= 1))
    def _():
        y = acc_ref[...] + b_ref[...].astype(jnp.float32)
        half = d_k // 2
        parts = []
        for lo in range(0, y.shape[1], d_k):     # static per-head roll
            parts.append(y[:, lo + half:lo + d_k])
            parts.append(y[:, lo:lo + half])
        rolled = jnp.concatenate(parts, axis=-1)
        o_ref[...] = (y * cos_ref[...] + rolled * sin_ref[...]
                      ).astype(o_ref.dtype)

    # V rows: bias only.
    @pl.when(last & (p == 2))
    def _():
        o_ref[...] = (acc_ref[...] + b_ref[...].astype(jnp.float32)
                      ).astype(o_ref.dtype)


def pallas_qkv_rope_project(x, w_stack, b_stack, cos_md, sin_md, *,
                            d_k, shared_x, mxu_dtype,
                            tm=512, tn=512, tk=512):
    """Stacked Q/K/V projections + RoPE epilogue in one pallas_call.

    x: (M, K) if shared_x (self-attention) else (3, M, K).
    w_stack: (3, K, N), b_stack: (3, 1, N) (f32), cos_md/sin_md: (M, N) f32.
    Returns (3, M, N) with RoPE applied to slices 0 (Q) and 1 (K)."""
    M, K = (x.shape if shared_x else x.shape[1:])
    P, _, N = w_stack.shape
    tm = _pick_tile(M, tm, align=8)
    tn = _pick_tile(N, tn, align=_lcm(128, d_k))
    # When K fits, drop the reduction tiling so the X block index is constant
    # across the (N, qkv) axes and Pallas elides its re-fetch (true sharing).
    tk = K if K <= 1024 else _pick_tile(K, tk, align=128)
    grid = (M // tm, N // tn, P, K // tk)      # grid order: (i, j, p, k)

    if shared_x:
        x_spec = pl.BlockSpec((tm, tk), lambda i, j, p, k: (i, k))
    else:
        x_spec = pl.BlockSpec((None, tm, tk), lambda i, j, p, k: (p, i, k))

    kernel = functools.partial(_qkv_rope_kernel, d_k=d_k, mxu_dtype=mxu_dtype)
    return pl.pallas_call(
        kernel,
        out_shape=jax.ShapeDtypeStruct((P, M, N), x.dtype),
        grid=grid,
        in_specs=[
            x_spec,
            pl.BlockSpec((None, tk, tn), lambda i, j, p, k: (p, k, j)),
            pl.BlockSpec((None, 1, tn), lambda i, j, p, k: (p, 0, j)),
            pl.BlockSpec((tm, tn), lambda i, j, p, k: (i, j)),
            pl.BlockSpec((tm, tn), lambda i, j, p, k: (i, j)),
        ],
        out_specs=pl.BlockSpec((None, tm, tn), lambda i, j, p, k: (p, i, j)),
        scratch_shapes=[pltpu.VMEM((tm, tn), jnp.float32)],
        compiler_params=pltpu.CompilerParams(
            dimension_semantics=("parallel", "parallel", "parallel",
                                 "arbitrary")),
    )(x, w_stack, b_stack, cos_md, sin_md)


# ---------------------------------------------------------------------------
# Plain tiled linear (output projection)
# ---------------------------------------------------------------------------

def _linear_kernel(x_ref, w_ref, b_ref, o_ref, acc_ref, *, mxu_dtype):
    k = pl.program_id(2)

    @pl.when(k == 0)
    def _():
        acc_ref[...] = jnp.zeros_like(acc_ref)

    acc_ref[...] += jnp.dot(x_ref[...].astype(mxu_dtype),
                            w_ref[...].astype(mxu_dtype),
                            preferred_element_type=jnp.float32)

    @pl.when(k == pl.num_programs(2) - 1)
    def _():
        o_ref[...] = (acc_ref[...] + b_ref[...].astype(jnp.float32)
                      ).astype(o_ref.dtype)


def pallas_linear(x2d, w, b, *, mxu_dtype=None, tm=512, tn=512, tk=512):
    """Tiled y = x2d @ w + b.  x2d: (M, K), w: (K, N), b: (N,) f32."""
    M, K = x2d.shape
    N = w.shape[1]
    mxu_dtype = mxu_dtype or x2d.dtype
    tm = _pick_tile(M, tm, align=8)
    tn = _pick_tile(N, tn, align=128)
    tk = K if K <= 1024 else _pick_tile(K, tk, align=128)
    grid = (M // tm, N // tn, K // tk)
    return pl.pallas_call(
        functools.partial(_linear_kernel, mxu_dtype=mxu_dtype),
        out_shape=jax.ShapeDtypeStruct((M, N), x2d.dtype),
        grid=grid,
        in_specs=[
            pl.BlockSpec((tm, tk), lambda i, j, k: (i, k)),
            pl.BlockSpec((tk, tn), lambda i, j, k: (k, j)),
            pl.BlockSpec((1, tn), lambda i, j, k: (0, j)),
        ],
        out_specs=pl.BlockSpec((tm, tn), lambda i, j, k: (i, j)),
        scratch_shapes=[pltpu.VMEM((tm, tn), jnp.float32)],
        compiler_params=pltpu.CompilerParams(
            dimension_semantics=("parallel", "parallel", "arbitrary")),
    )(x2d, w.astype(mxu_dtype), b.reshape(1, N))


# ---------------------------------------------------------------------------
# Pure flash attention (RoPE and score scale already applied upstream)
# ---------------------------------------------------------------------------

def _flash_attention_kernel(q_ref, k_ref, v_ref, o_ref,
                            acc_ref, m_ref, l_ref, *, num_heads, d_k,
                            mxu_dtype):
    ki = pl.program_id(2)

    @pl.when(ki == 0)
    def _():
        acc_ref[...] = jnp.zeros_like(acc_ref)
        m_ref[...] = jnp.full_like(m_ref, -jnp.inf)
        l_ref[...] = jnp.zeros_like(l_ref)

    q_m = q_ref[...].astype(mxu_dtype)          # (tq, D)
    k_m = k_ref[...].astype(mxu_dtype)          # (tkv, D)
    v_m = v_ref[...].astype(mxu_dtype)          # (tkv, D)

    # TODO(synk): for very large H, bound live ranges with a fori_loop or a
    #             head-major layout + heads grid axis instead of this unroll.
    for h in range(num_heads):
        lo = h * d_k
        hi = lo + d_k
        # (tq, tkv) scores; contract feature dims directly (no k.T copy).
        s = jax.lax.dot_general(
            q_m[:, lo:hi], k_m[:, lo:hi],
            dimension_numbers=(((1,), (1,)), ((), ())),
            preferred_element_type=jnp.float32)

        m_prev = m_ref[h]                       # (tq, 1)
        l_prev = l_ref[h]
        m_new = jnp.maximum(m_prev, jnp.max(s, axis=-1, keepdims=True))
        alpha = jnp.exp(m_prev - m_new)
        p = jnp.exp(s - m_new)
        l_ref[h] = alpha * l_prev + jnp.sum(p, axis=-1, keepdims=True)
        m_ref[h] = m_new
        # Head-major accumulator: whole-block store, no sub-lane RMW.
        acc_ref[h] = alpha * acc_ref[h] + jnp.dot(
            p.astype(mxu_dtype), v_m[:, lo:hi],
            preferred_element_type=jnp.float32)

    @pl.when(ki == pl.num_programs(2) - 1)
    def _():
        # Exact normalization (runs once per q tile), one lane-dense store.
        cols = [acc_ref[h] / l_ref[h] for h in range(num_heads)]
        o_ref[...] = jnp.concatenate(cols, axis=-1).astype(o_ref.dtype)


def pallas_flash_attention(qkv, *, num_heads, mxu_dtype=None,
                           tq=384, tkv=256):
    """qkv: (3, B, S, D) stacked pre-rotated, pre-scaled q/k/v projections.
    Returns the attention context of shape (B, S, D)."""
    _, B, S, D = qkv.shape
    d_k = D // num_heads
    mxu_dtype = mxu_dtype or qkv.dtype
    tq = _pick_tile(S, tq, align=8)
    tkv = _pick_tile(S, tkv, align=8)
    grid = (B, S // tq, S // tkv)
    kernel = functools.partial(_flash_attention_kernel, num_heads=num_heads,
                               d_k=d_k, mxu_dtype=mxu_dtype)
    return pl.pallas_call(
        kernel,
        out_shape=jax.ShapeDtypeStruct((B, S, D), qkv.dtype),
        grid=grid,
        in_specs=[
            pl.BlockSpec((None, None, tq, D), lambda b, qi, ki: (0, b, qi, 0)),
            pl.BlockSpec((None, None, tkv, D), lambda b, qi, ki: (1, b, ki, 0)),
            pl.BlockSpec((None, None, tkv, D), lambda b, qi, ki: (2, b, ki, 0)),
        ],
        out_specs=pl.BlockSpec((None, tq, D), lambda b, qi, ki: (b, qi, 0)),
        scratch_shapes=[
            pltpu.VMEM((num_heads, tq, d_k), jnp.float32),   # acc (head-major)
            pltpu.VMEM((num_heads, tq, 1), jnp.float32),     # running max
            pltpu.VMEM((num_heads, tq, 1), jnp.float32),     # running sum
        ],
        compiler_params=pltpu.CompilerParams(
            dimension_semantics=("parallel", "parallel", "arbitrary")),
    )(qkv, qkv, qkv)


# ---------------------------------------------------------------------------
# Module glue (plain JAX)
# ---------------------------------------------------------------------------

def build_rotary_pos_emb(dim, seq_len):
    inv_freq = 1.0 / (10000.0 ** (jnp.arange(0, dim, 2, dtype=jnp.float32) / dim))
    t = jnp.arange(seq_len, dtype=jnp.float32)
    freqs = jnp.einsum("i,j->ij", t, inv_freq)
    emb = jnp.concatenate([freqs, freqs], axis=-1)   # (seq_len, dim)
    return jnp.cos(emb), jnp.sin(emb)


def init_params(key, d_model):
    # nn.Linear init: U(-1/sqrt(in), 1/sqrt(in)); weights stored (in, out).
    bound = 1.0 / math.sqrt(d_model)
    ks = jax.random.split(key, 8)

    def lin(kw, kb):
        w = jax.random.uniform(kw, (d_model, d_model), jnp.float32, -bound, bound)
        b = jax.random.uniform(kb, (d_model,), jnp.float32, -bound, bound)
        return w, b

    wq, bq = lin(ks[0], ks[1])
    wk, bk = lin(ks[2], ks[3])
    wv, bv = lin(ks[4], ks[5])
    wo, bo = lin(ks[6], ks[7])
    return dict(w_qkv=jnp.stack([wq, wk, wv]),   # (3, D, D)
                b_qkv=jnp.stack([bq, bk, bv]),   # (3, D)
                wo=wo, bo=bo)


def multi_headed_attention(params, query, key, value, h, cos_full, sin_full,
                           *, fuse_qkv=False, mxu_dtype=None):
    B, S, D = query.shape
    assert D % h == 0
    d_k = D // h
    half = d_k // 2
    M = B * S
    mxu_dtype = mxu_dtype or query.dtype

    # Fold 1/sqrt(d_k) into the Q projection (exact: RoPE is linear).
    scale = 1.0 / math.sqrt(d_k)
    gains = jnp.array([scale, 1.0, 1.0], dtype=params["w_qkv"].dtype)
    w_stack = (params["w_qkv"] * gains[:, None, None]).astype(mxu_dtype)
    b_stack = (params["b_qkv"] * gains[:, None]).reshape(3, 1, D)  # f32

    # RoPE tables as (M, D): rows tiled over batch, columns tiled over heads,
    # rotate_half's sign folded into sin.  Kept f32 for the epilogue math.
    cos_sd = cos_full[:S].astype(jnp.float32)
    sin_sd = sin_full[:S].astype(jnp.float32)
    sin_fold = jnp.concatenate([-sin_sd[:, :half], sin_sd[:, half:]], axis=-1)
    cos_md = jnp.tile(cos_sd, (B, h))
    sin_md = jnp.tile(sin_fold, (B, h))

    # --- fused QKV projection + RoPE epilogue (one pallas_call) -------------
    if fuse_qkv:
        x = query.reshape(M, D)                       # shared X tile
        shared_x = True
    else:
        # TODO(synk): stacking the inputs costs one 3*M*D copy; a zero-copy
        #             variant needs input_output_aliases into a preallocated
        #             buffer.
        x = jnp.stack([query.reshape(M, D), key.reshape(M, D),
                       value.reshape(M, D)], axis=0)
        shared_x = False

    qkv2d = pallas_qkv_rope_project(x, w_stack, b_stack, cos_md, sin_md,
                                    d_k=d_k, shared_x=shared_x,
                                    mxu_dtype=mxu_dtype)       # (3, M, D)
    qkv = qkv2d.reshape(3, B, S, D)                  # free reshape

    # --- pure flash attention (RoPE / scale already applied) ----------------
    ctx = pallas_flash_attention(qkv, num_heads=h, mxu_dtype=mxu_dtype)

    # --- output projection ---------------------------------------------------
    out = pallas_linear(ctx.reshape(M, D), params["wo"], params["bo"],
                        mxu_dtype=mxu_dtype)
    return out.reshape(B, S, D)


# ---------------------------------------------------------------------------
# Pure-JAX reference (mirrors the PyTorch forward, eval-mode dropout)
# ---------------------------------------------------------------------------

def _ref_forward(params, query, key, value, h, cos_full, sin_full):
    B, S, D = query.shape
    d_k = D // h

    def rot_half(x):
        x1, x2 = jnp.split(x, 2, axis=-1)
        return jnp.concatenate([-x2, x1], axis=-1)

    def project(x, w, b):
        return (x @ w + b).reshape(B, S, h, d_k).transpose(0, 2, 1, 3)

    q = project(query, params["w_qkv"][0], params["b_qkv"][0])
    k = project(key, params["w_qkv"][1], params["b_qkv"][1])
    v = project(value, params["w_qkv"][2], params["b_qkv"][2])

    c = cos_full[None, None, :S, :]
    s = sin_full[None, None, :S, :]
    q = q * c + rot_half(q) * s
    k = k * c + rot_half(k) * s

    scores = jnp.einsum("bhqd,bhkd->bhqk", q, k) / math.sqrt(d_k)
    p = jax.nn.softmax(scores, axis=-1)
    x = jnp.einsum("bhqk,bhkd->bhqd", p, v)
    x = x.transpose(0, 2, 1, 3).reshape(B, S, D)
    return x @ params["wo"] + params["bo"]


# ---------------------------------------------------------------------------

if __name__ == "__main__":
    B, S, H, D_MODEL = 2, 8, 4, 32
    MAX_SEQ_LEN = 16
    d_k = D_MODEL // H

    root = jax.random.PRNGKey(0)
    k_param, k_q, k_k, k_v = jax.random.split(root, 4)

    params = init_params(k_param, D_MODEL)
    cos_full, sin_full = build_rotary_pos_emb(d_k, MAX_SEQ_LEN)

    query = jax.random.normal(k_q, (B, S, D_MODEL), jnp.float32)
    key_in = jax.random.normal(k_k, (B, S, D_MODEL), jnp.float32)
    value_in = jax.random.normal(k_v, (B, S, D_MODEL), jnp.float32)

    fwd_self = jax.jit(functools.partial(
        multi_headed_attention, h=H, cos_full=cos_full, sin_full=sin_full,
        fuse_qkv=True))
    fwd_cross = jax.jit(functools.partial(
        multi_headed_attention, h=H, cos_full=cos_full, sin_full=sin_full,
        fuse_qkv=False))

    # f32 path (MXU operands stay f32 -> exact comparison vs f32 reference).
    out_self = jax.block_until_ready(fwd_self(params, query, query, query))
    out_cross = jax.block_until_ready(fwd_cross(params, query, key_in, value_in))

    ref_self = _ref_forward(params, query, query, query, H, cos_full, sin_full)
    ref_cross = _ref_forward(params, query, key_in, value_in, H, cos_full, sin_full)

    assert out_self.shape == (B, S, D_MODEL)
    assert out_cross.shape == (B, S, D_MODEL)
    assert jnp.allclose(out_self, ref_self, atol=1e-3, rtol=1e-3), \
        "self-attention (f32) mismatch vs reference"
    assert jnp.allclose(out_cross, ref_cross, atol=1e-3, rtol=1e-3), \
        "cross-attention (f32) mismatch vs reference"

    # bf16 activations exercise the bf16-native MXU path (operands bf16,
    # accumulation / softmax / RoPE math stays f32).
    q16 = query.astype(jnp.bfloat16)
    out_b16 = jax.block_until_ready(fwd_self(params, q16, q16, q16))
    ref_b16 = _ref_forward(params, q16.astype(jnp.float32),
                           q16.astype(jnp.float32), q16.astype(jnp.float32),
                           H, cos_full, sin_full)
    assert out_b16.dtype == jnp.bfloat16
    assert jnp.allclose(out_b16.astype(jnp.float32), ref_b16,
                        atol=2e-1, rtol=1e-1), "bf16 path mismatch vs reference"

    print("KERNEL_OK")
</pallas_src>

<mosaic_0001>
module attributes {stable_mosaic.version = 11 : i64} {
  func.func @_linear_kernel(%arg0: i32, %arg1: i32, %arg2: i32, %arg3: memref<16x32xf32, #tpu.memory_space<vmem>>, %arg4: memref<32x32xf32, #tpu.memory_space<vmem>>, %arg5: memref<1x32xf32, #tpu.memory_space<vmem>>, %arg6: memref<16x32xf32, #tpu.memory_space<vmem>>, %arg7: memref<16x32xf32, #tpu.memory_space<vmem>>) attributes {dimension_semantics = [#tpu.dimension_semantics<parallel>, #tpu.dimension_semantics<parallel>, #tpu.dimension_semantics<arbitrary>], iteration_bounds = array<i64: 1, 1, 1>, scalar_prefetch = 0 : i64, scratch_operands = 1 : i64, tpu.core_type = #tpu.core_type<tc>, window_params = [{transform_indices = @transform_0, window_bounds = array<i64: 16, 32>}, {transform_indices = @transform_1, window_bounds = array<i64: 32, 32>}, {transform_indices = @transform_2, window_bounds = array<i64: 1, 32>}, {transform_indices = @transform_3, window_bounds = array<i64: 16, 32>}]} {
    %c0_i32 = arith.constant 0 : i32
    %0 = arith.cmpi eq, %arg2, %c0_i32 : i32
    %1 = arith.extui %0 : i1 to i32
    %c0_i32_0 = arith.constant 0 : i32
    %2 = arith.cmpi ne, %1, %c0_i32_0 : i32
    scf.if %2 {
      %cst_10 = arith.constant 0.000000e+00 : f32
      %12 = vector.broadcast %cst_10 : f32 to vector<16x32xf32>
      %c0_11 = arith.constant 0 : index
      %c0_12 = arith.constant 0 : index
      %13 = vector.load %arg7[%c0_11, %c0_12] : memref<16x32xf32, #tpu.memory_space<vmem>>, vector<16x32xf32>
      tpu.vector_store %arg7[%c0_11, %c0_12], %12 {strides = array<i32>} : memref<16x32xf32, #tpu.memory_space<vmem>>, vector<16x32xf32>,
    } else {
    }
    %c0 = arith.constant 0 : index
    %c0_1 = arith.constant 0 : index
    %3 = vector.load %arg7[%c0, %c0_1] : memref<16x32xf32, #tpu.memory_space<vmem>>, vector<16x32xf32>
    %c0_2 = arith.constant 0 : index
    %c0_3 = arith.constant 0 : index
    %4 = vector.load %arg3[%c0_2, %c0_3] : memref<16x32xf32, #tpu.memory_space<vmem>>, vector<16x32xf32>
    %c0_4 = arith.constant 0 : index
    %c0_5 = arith.constant 0 : index
    %5 = vector.load %arg4[%c0_4, %c0_5] : memref<32x32xf32, #tpu.memory_space<vmem>>, vector<32x32xf32>
    %cst = arith.constant dense<0.000000e+00> : vector<16x32xf32>
    %6 = tpu.matmul %4, %5, %cst {dimension_numbers = #tpu.dot_dimension_numbers<[1], [0], [0], [1], [0, 0, 1, 1], [], []>} : vector<16x32xf32>, vector<32x32xf32>, vector<16x32xf32> -> vector<16x32xf32>
    %7 = arith.addf %3, %6 : vector<16x32xf32>
    %c0_6 = arith.constant 0 : index
    %c0_7 = arith.constant 0 : index
    %8 = vector.load %arg7[%c0_6, %c0_7] : memref<16x32xf32, #tpu.memory_space<vmem>>, vector<16x32xf32>
    tpu.vector_store %arg7[%c0_6, %c0_7], %7 {strides = array<i32>} : memref<16x32xf32, #tpu.memory_space<vmem>>, vector<16x32xf32>,
    %c0_i32_8 = arith.constant 0 : i32
    %9 = arith.cmpi eq, %arg2, %c0_i32_8 : i32
    %10 = arith.extui %9 : i1 to i32
    %c0_i32_9 = arith.constant 0 : i32
    %11 = arith.cmpi ne, %10, %c0_i32_9 : i32
    scf.if %11 {
      %c0_10 = arith.constant 0 : index
      %c0_11 = arith.constant 0 : index
      %12 = vector.load %arg7[%c0_10, %c0_11] : memref<16x32xf32, #tpu.memory_space<vmem>>, vector<16x32xf32>
      %c0_12 = arith.constant 0 : index
      %c0_13 = arith.constant 0 : index
      %13 = vector.load %arg5[%c0_12, %c0_13] : memref<1x32xf32, #tpu.memory_space<vmem>>, vector<1x32xf32>
      %14 = vector.broadcast %13 : vector<1x32xf32> to vector<16x32xf32>
      %15 = arith.addf %12, %14 : vector<16x32xf32>
      %c0_14 = arith.constant 0 : index
      %c0_15 = arith.constant 0 : index
      %16 = vector.load %arg6[%c0_14, %c0_15] : memref<16x32xf32, #tpu.memory_space<vmem>>, vector<16x32xf32>
      tpu.vector_store %arg6[%c0_14, %c0_15], %15 {strides = array<i32>} : memref<16x32xf32, #tpu.memory_space<vmem>>, vector<16x32xf32>,
    } else {
    }
    return
  }
  func.func @transform_0(%arg0: i32, %arg1: i32, %arg2: i32) -> (i32, i32) {
    %c0_i32 = arith.constant 0 : i32
    return %arg0, %arg2 : i32, i32
  }
  func.func @transform_1(%arg0: i32, %arg1: i32, %arg2: i32) -> (i32, i32) {
    %c0_i32 = arith.constant 0 : i32
    return %arg2, %arg1 : i32, i32
  }
  func.func @transform_2(%arg0: i32, %arg1: i32, %arg2: i32) -> (i32, i32) {
    %c0_i32 = arith.constant 0 : i32
    %c0_i32_0 = arith.constant 0 : i32
    return %c0_i32, %arg1 : i32, i32
  }
  func.func @transform_3(%arg0: i32, %arg1: i32, %arg2: i32) -> (i32, i32) {
    %c0_i32 = arith.constant 0 : i32
    return %arg0, %arg1 : i32, i32
  }
}

module attributes {stable_mosaic.version = 11 : i64} {
  func.func @_qkv_rope_kernel(%arg0: i32, %arg1: i32, %arg2: i32, %arg3: i32, %arg4: memref<16x32xf32, #tpu.memory_space<vmem>>, %arg5: memref<1x32x32xf32, #tpu.memory_space<vmem>>, %arg6: memref<1x1x32xf32, #tpu.memory_space<vmem>>, %arg7: memref<16x32xf32, #tpu.memory_space<vmem>>, %arg8: memref<16x32xf32, #tpu.memory_space<vmem>>, %arg9: memref<1x16x32xf32, #tpu.memory_space<vmem>>, %arg10: memref<16x32xf32, #tpu.memory_space<vmem>>) attributes {dimension_semantics = [#tpu.dimension_semantics<parallel>, #tpu.dimension_semantics<parallel>, #tpu.dimension_semantics<parallel>, #tpu.dimension_semantics<arbitrary>], iteration_bounds = array<i64: 1, 1, 3, 1>, scalar_prefetch = 0 : i64, scratch_operands = 1 : i64, tpu.core_type = #tpu.core_type<tc>, window_params = [{transform_indices = @transform_0, window_bounds = array<i64: 16, 32>}, {transform_indices = @transform_1, window_bounds = array<i64: 1, 32, 32>}, {transform_indices = @transform_2, window_bounds = array<i64: 1, 1, 32>}, {transform_indices = @transform_3, window_bounds = array<i64: 16, 32>}, {transform_indices = @transform_4, window_bounds = array<i64: 16, 32>}, {transform_indices = @transform_5, window_bounds = array<i64: 1, 16, 32>}]} {
    %c0_i32 = arith.constant 0 : i32
    %0 = arith.cmpi eq, %arg3, %c0_i32 : i32
    %c0_i32_0 = arith.constant 0 : i32
    %1 = arith.cmpi eq, %arg3, %c0_i32_0 : i32
    %2 = arith.extui %1 : i1 to i32
    %c0_i32_1 = arith.constant 0 : i32
    %3 = arith.cmpi ne, %2, %c0_i32_1 : i32
    scf.if %3 {
      %cst_12 = arith.constant 0.000000e+00 : f32
      %19 = vector.broadcast %cst_12 : f32 to vector<16x32xf32>
      %c0_13 = arith.constant 0 : index
      %c0_14 = arith.constant 0 : index
      %20 = vector.load %arg10[%c0_13, %c0_14] : memref<16x32xf32, #tpu.memory_space<vmem>>, vector<16x32xf32>
      tpu.vector_store %arg10[%c0_13, %c0_14], %19 {strides = array<i32>} : memref<16x32xf32, #tpu.memory_space<vmem>>, vector<16x32xf32>,
    } else {
    }
    %c0 = arith.constant 0 : index
    %c0_2 = arith.constant 0 : index
    %4 = vector.load %arg10[%c0, %c0_2] : memref<16x32xf32, #tpu.memory_space<vmem>>, vector<16x32xf32>
    %c0_3 = arith.constant 0 : index
    %c0_4 = arith.constant 0 : index
    %5 = vector.load %arg4[%c0_3, %c0_4] : memref<16x32xf32, #tpu.memory_space<vmem>>, vector<16x32xf32>
    %c0_5 = arith.constant 0 : index
    %c0_6 = arith.constant 0 : index
    %c0_7 = arith.constant 0 : index
    %6 = vector.load %arg5[%c0_5, %c0_6, %c0_7] : memref<1x32x32xf32, #tpu.memory_space<vmem>>, vector<1x32x32xf32>
    %7 = vector.shape_cast %6 : vector<1x32x32xf32> to vector<32x32xf32>
    %cst = arith.constant dense<0.000000e+00> : vector<16x32xf32>
    %8 = tpu.matmul %5, %7, %cst {dimension_numbers = #tpu.dot_dimension_numbers<[1], [0], [0], [1], [0, 0, 1, 1], [], []>} : vector<16x32xf32>, vector<32x32xf32>, vector<16x32xf32> -> vector<16x32xf32>
    %9 = arith.addf %4, %8 : vector<16x32xf32>
    %c0_8 = arith.constant 0 : index
    %c0_9 = arith.constant 0 : index
    %10 = vector.load %arg10[%c0_8, %c0_9] : memref<16x32xf32, #tpu.memory_space<vmem>>, vector<16x32xf32>
    tpu.vector_store %arg10[%c0_8, %c0_9], %9 {strides = array<i32>} : memref<16x32xf32, #tpu.memory_space<vmem>>, vector<16x32xf32>,
    %c1_i32 = arith.constant 1 : i32
    %11 = arith.cmpi sle, %arg2, %c1_i32 : i32
    %12 = arith.andi %0, %11 : i1
    %13 = arith.extui %12 : i1 to i32
    %c0_i32_10 = arith.constant 0 : i32
    %14 = arith.cmpi ne, %13, %c0_i32_10 : i32
    scf.if %14 {
      %c0_12 = arith.constant 0 : index
      %c0_13 = arith.constant 0 : index
      %19 = vector.load %arg10[%c0_12, %c0_13] : memref<16x32xf32, #tpu.memory_space<vmem>>, vector<16x32xf32>
      %c0_14 = arith.constant 0 : index
      %c0_15 = arith.constant 0 : index
      %c0_16 = arith.constant 0 : index
      %20 = vector.load %arg6[%c0_14, %c0_15, %c0_16] : memref<1x1x32xf32, #tpu.memory_space<vmem>>, vector<1x1x32xf32>
      %21 = vector.shape_cast %20 : vector<1x1x32xf32> to vector<1x32xf32>
      %22 = vector.broadcast %21 : vector<1x32xf32> to vector<16x32xf32>
      %23 = arith.addf %19, %22 : vector<16x32xf32>
      %24 = vector.extract_strided_slice %23 {offsets = [0, 4], sizes = [16, 4], strides = [1, 1]} : vector<16x32xf32> to vector<16x4xf32>
      %25 = vector.extract_strided_slice %23 {offsets = [0, 0], sizes = [16, 4], strides = [1, 1]} : vector<16x32xf32> to vector<16x4xf32>
      %26 = vector.extract_strided_slice %23 {offsets = [0, 12], sizes = [16, 4], strides = [1, 1]} : vector<16x32xf32> to vector<16x4xf32>
      %27 = vector.extract_strided_slice %23 {offsets = [0, 8], sizes = [16, 4], strides = [1, 1]} : vector<16x32xf32> to vector<16x4xf32>
      %28 = vector.extract_strided_slice %23 {offsets = [0, 20], sizes = [16, 4], strides = [1, 1]} : vector<16x32xf32> to vector<16x4xf32>
      %29 = vector.extract_strided_slice %23 {offsets = [0, 16], sizes = [16, 4], strides = [1, 1]} : vector<16x32xf32> to vector<16x4xf32>
      %30 = vector.extract_strided_slice %23 {offsets = [0, 28], sizes = [16, 4], strides = [1, 1]} : vector<16x32xf32> to vector<16x4xf32>
      %31 = vector.extract_strided_slice %23 {offsets = [0, 24], sizes = [16, 4], strides = [1, 1]} : vector<16x32xf32> to vector<16x4xf32>
      %32 = tpu.concatenate %24, %25, %26, %27, %28, %29, %30, %31 in 1 : vector<16x4xf32>, vector<16x4xf32>, vector<16x4xf32>, vector<16x4xf32>, vector<16x4xf32>, vector<16x4xf32>, vector<16x4xf32>, vector<16x4xf32> -> vector<16x32xf32>
      %c0_17 = arith.constant 0 : index
      %c0_18 = arith.constant 0 : index
      %33 = vector.load %arg7[%c0_17, %c0_18] : memref<16x32xf32, #tpu.memory_space<vmem>>, vector<16x32xf32>
      %34 = arith.mulf %23, %33 : vector<16x32xf32>
      %c0_19 = arith.constant 0 : index
      %c0_20 = arith.constant 0 : index
      %35 = vector.load %arg8[%c0_19, %c0_20] : memref<16x32xf32, #tpu.memory_space<vmem>>, vector<16x32xf32>
      %36 = arith.mulf %32, %35 : vector<16x32xf32>
      %37 = arith.addf %34, %36 : vector<16x32xf32>
      %c0_21 = arith.constant 0 : index
      %c0_22 = arith.constant 0 : index
      %c0_23 = arith.constant 0 : index
      %38 = vector.load %arg9[%c0_21, %c0_22, %c0_23] : memref<1x16x32xf32, #tpu.memory_space<vmem>>, vector<1x16x32xf32>
      %39 = vector.shape_cast %38 : vector<1x16x32xf32> to vector<16x32xf32>
      %40 = vector.shape_cast %37 : vector<16x32xf32> to vector<1x16x32xf32>
      tpu.vector_store %arg9[%c0_21, %c0_22, %c0_23], %40 {strides = array<i32>} : memref<1x16x32xf32, #tpu.memory_space<vmem>>, vector<1x16x32xf32>,
    } else {
    }
    %c2_i32 = arith.constant 2 : i32
    %15 = arith.cmpi eq, %arg2, %c2_i32 : i32
    %16 = arith.andi %0, %15 : i1
    %17 = arith.extui %16 : i1 to i32
    %c0_i32_11 = arith.constant 0 : i32
    %18 = arith.cmpi ne, %17, %c0_i32_11 : i32
    scf.if %18 {
      %c0_12 = arith.constant 0 : index
      %c0_13 = arith.constant 0 : index
      %19 = vector.load %arg10[%c0_12, %c0_13] : memref<16x32xf32, #tpu.memory_space<vmem>>, vector<16x32xf32>
      %c0_14 = arith.constant 0 : index
      %c0_15 = arith.constant 0 : index
      %c0_16 = arith.constant 0 : index
      %20 = vector.load %arg6[%c0_14, %c0_15, %c0_16] : memref<1x1x32xf32, #tpu.memory_space<vmem>>, vector<1x1x32xf32>
      %21 = vector.shape_cast %20 : vector<1x1x32xf32> to vector<1x32xf32>
      %22 = vector.broadcast %21 : vector<1x32xf32> to vector<16x32xf32>
      %23 = arith.addf %19, %22 : vector<16x32xf32>
      %c0_17 = arith.constant 0 : index
      %c0_18 = arith.constant 0 : index
      %c0_19 = arith.constant 0 : index
      %24 = vector.load %arg9[%c0_17, %c0_18, %c0_19] : memref<1x16x32xf32, #tpu.memory_space<vmem>>, vector<1x16x32xf32>
      %25 = vector.shape_cast %24 : vector<1x16x32xf32> to vector<16x32xf32>
      %26 = vector.shape_cast %23 : vector<16x32xf32> to vector<1x16x32xf32>
      tpu.vector_store %arg9[%c0_17, %c0_18, %c0_19], %26 {strides = array<i32>} : memref<1x16x32xf32, #tpu.memory_space<vmem>>, vector<1x16x32xf32>,
    } else {
    }
    return
  }
  func.func @transform_0(%arg0: i32, %arg1: i32, %arg2: i32, %arg3: i32) -> (i32, i32) {
    %c0_i32 = arith.constant 0 : i32
    return %arg0, %arg3 : i32, i32
  }
  func.func @transform_1(%arg0: i32, %arg1: i32, %arg2: i32, %arg3: i32) -> (i32, i32, i32) {
    %c0_i32 = arith.constant 0 : i32
    return %arg2, %arg3, %arg1 : i32, i32, i32
  }
  func.func @transform_2(%arg0: i32, %arg1: i32, %arg2: i32, %arg3: i32) -> (i32, i32, i32) {
    %c0_i32 = arith.constant 0 : i32
    %c0_i32_0 = arith.constant 0 : i32
    return %arg2, %c0_i32, %arg1 : i32, i32, i32
  }
  func.func @transform_3(%arg0: i32, %arg1: i32, %arg2: i32, %arg3: i32) -> (i32, i32) {
    %c0_i32 = arith.constant 0 : i32
    return %arg0, %arg1 : i32, i32
  }
  func.func @transform_4(%arg0: i32, %arg1: i32, %arg2: i32, %arg3: i32) -> (i32, i32) {
    %c0_i32 = arith.constant 0 : i32
    return %arg0, %arg1 : i32, i32
  }
  func.func @transform_5(%arg0: i32, %arg1: i32, %arg2: i32, %arg3: i32) -> (i32, i32, i32) {
    %c0_i32 = arith.constant 0 : i32
    return %arg2, %arg0, %arg1 : i32, i32, i32
  }
}

module attributes {stable_mosaic.version = 11 : i64} {
  func.func @_flash_attention_kernel(%arg0: i32, %arg1: i32, %arg2: i32, %arg3: memref<1x1x8x32xf32, #tpu.memory_space<vmem>>, %arg4: memref<1x1x8x32xf32, #tpu.memory_space<vmem>>, %arg5: memref<1x1x8x32xf32, #tpu.memory_space<vmem>>, %arg6: memref<1x8x32xf32, #tpu.memory_space<vmem>>, %arg7: memref<4x8x8xf32, #tpu.memory_space<vmem>>, %arg8: memref<4x8x1xf32, #tpu.memory_space<vmem>>, %arg9: memref<4x8x1xf32, #tpu.memory_space<vmem>>) attributes {dimension_semantics = [#tpu.dimension_semantics<parallel>, #tpu.dimension_semantics<parallel>, #tpu.dimension_semantics<arbitrary>], iteration_bounds = array<i64: 2, 1, 1>, scalar_prefetch = 0 : i64, scratch_operands = 3 : i64, tpu.core_type = #tpu.core_type<tc>, window_params = [{transform_indices = @transform_0, window_bounds = array<i64: 1, 1, 8, 32>}, {transform_indices = @transform_1, window_bounds = array<i64: 1, 1, 8, 32>}, {transform_indices = @transform_2, window_bounds = array<i64: 1, 1, 8, 32>}, {transform_indices = @transform_3, window_bounds = array<i64: 1, 8, 32>}]} {
    %c0_i32 = arith.constant 0 : i32
    %0 = arith.cmpi eq, %arg2, %c0_i32 : i32
    %1 = arith.extui %0 : i1 to i32
    %c0_i32_0 = arith.constant 0 : i32
    %2 = arith.cmpi ne, %1, %c0_i32_0 : i32
    scf.if %2 {
      %cst_98 = arith.constant 0.000000e+00 : f32
      %152 = vector.broadcast %cst_98 : f32 to vector<4x8x8xf32>
      %c0_99 = arith.constant 0 : index
      %c0_100 = arith.constant 0 : index
      %c0_101 = arith.constant 0 : index
      %153 = vector.load %arg7[%c0_99, %c0_100, %c0_101] : memref<4x8x8xf32, #tpu.memory_space<vmem>>, vector<4x8x8xf32>
      tpu.vector_store %arg7[%c0_99, %c0_100, %c0_101], %152 {strides = array<i32>} : memref<4x8x8xf32, #tpu.memory_space<vmem>>, vector<4x8x8xf32>,
      %cst_102 = arith.constant 0xFF800000 : f32
      %154 = vector.broadcast %cst_102 : f32 to vector<4x8x1xf32>
      %c0_103 = arith.constant 0 : index
      %c0_104 = arith.constant 0 : index
      %c0_105 = arith.constant 0 : index
      %155 = vector.load %arg8[%c0_103, %c0_104, %c0_105] : memref<4x8x1xf32, #tpu.memory_space<vmem>>, vector<4x8x1xf32>
      tpu.vector_store %arg8[%c0_103, %c0_104, %c0_105], %154 {strides = array<i32>} : memref<4x8x1xf32, #tpu.memory_space<vmem>>, vector<4x8x1xf32>,
      %cst_106 = arith.constant 0.000000e+00 : f32
      %156 = vector.broadcast %cst_106 : f32 to vector<4x8x1xf32>
      %c0_107 = arith.constant 0 : index
      %c0_108 = arith.constant 0 : index
      %c0_109 = arith.constant 0 : index
      %157 = vector.load %arg9[%c0_107, %c0_108, %c0_109] : memref<4x8x1xf32, #tpu.memory_space<vmem>>, vector<4x8x1xf32>
      tpu.vector_store %arg9[%c0_107, %c0_108, %c0_109], %156 {strides = array<i32>} : memref<4x8x1xf32, #tpu.memory_space<vmem>>, vector<4x8x1xf32>,
    } else {
    }
    %c0 = arith.constant 0 : index
    %c0_1 = arith.constant 0 : index
    %c0_2 = arith.constant 0 : index
    %c0_3 = arith.constant 0 : index
    %3 = vector.load %arg3[%c0, %c0_1, %c0_2, %c0_3] : memref<1x1x8x32xf32, #tpu.memory_space<vmem>>, vector<1x1x8x32xf32>
    %4 = vector.shape_cast %3 : vector<1x1x8x32xf32> to vector<8x32xf32>
    %c0_4 = arith.constant 0 : index
    %c0_5 = arith.constant 0 : index
    %c0_6 = arith.constant 0 : index
    %c0_7 = arith.constant 0 : index
    %5 = vector.load %arg4[%c0_4, %c0_5, %c0_6, %c0_7] : memref<1x1x8x32xf32, #tpu.memory_space<vmem>>, vector<1x1x8x32xf32>
    %6 = vector.shape_cast %5 : vector<1x1x8x32xf32> to vector<8x32xf32>
    %c0_8 = arith.constant 0 : index
    %c0_9 = arith.constant 0 : index
    %c0_10 = arith.constant 0 : index
    %c0_11 = arith.constant 0 : index
    %7 = vector.load %arg5[%c0_8, %c0_9, %c0_10, %c0_11] : memref<1x1x8x32xf32, #tpu.memory_space<vmem>>, vector<1x1x8x32xf32>
    %8 = vector.shape_cast %7 : vector<1x1x8x32xf32> to vector<8x32xf32>
    %9 = vector.extract_strided_slice %4 {offsets = [0, 0], sizes = [8, 8], strides = [1, 1]} : vector<8x32xf32> to vector<8x8xf32>
    %10 = vector.extract_strided_slice %6 {offsets = [0, 0], sizes = [8, 8], strides = [1, 1]} : vector<8x32xf32> to vector<8x8xf32>
    %cst = arith.constant dense<0.000000e+00> : vector<8x8xf32>
    %11 = tpu.matmul %9, %10, %cst {dimension_numbers = #tpu.dot_dimension_numbers<[1], [1], [0], [0], [0, 0, 1, 0], [], []>} : vector<8x8xf32>, vector<8x8xf32>, vector<8x8xf32> -> vector<8x8xf32>
    %c0_12 = arith.constant 0 : index
    %c0_13 = arith.constant 0 : index
    %c0_14 = arith.constant 0 : index
    %12 = vector.load %arg8[%c0_12, %c0_13, %c0_14] : memref<4x8x1xf32, #tpu.memory_space<vmem>>, vector<1x8x1xf32>
    %13 = vector.shape_cast %12 : vector<1x8x1xf32> to vector<8x1xf32>
    %c0_15 = arith.constant 0 : index
    %c0_16 = arith.constant 0 : index
    %c0_17 = arith.constant 0 : index
    %14 = vector.load %arg9[%c0_15, %c0_16, %c0_17] : memref<4x8x1xf32, #tpu.memory_space<vmem>>, vector<1x8x1xf32>
    %15 = vector.shape_cast %14 : vector<1x8x1xf32> to vector<8x1xf32>
    %cst_18 = arith.constant dense<0xFF800000> : vector<8xf32>
    %16 = vector.multi_reduction <maximumf>, %11, %cst_18 [1] : vector<8x8xf32> to vector<8xf32>
    %17 = vector.shape_cast %16 : vector<8xf32> to vector<8x1xf32>
    %18 = arith.maximumf %13, %17 : vector<8x1xf32>
    %19 = arith.subf %13, %18 : vector<8x1xf32>
    %20 = math.exp %19 : vector<8x1xf32>
    %21 = vector.broadcast %18 : vector<8x1xf32> to vector<8x8xf32>
    %22 = arith.subf %11, %21 : vector<8x8xf32>
    %23 = math.exp %22 : vector<8x8xf32>
    %24 = arith.mulf %20, %15 : vector<8x1xf32>
    %cst_19 = arith.constant dense<0.000000e+00> : vector<8xf32>
    %25 = vector.multi_reduction <add>, %23, %cst_19 [1] : vector<8x8xf32> to vector<8xf32>
    %26 = vector.shape_cast %25 : vector<8xf32> to vector<8x1xf32>
    %27 = arith.addf %24, %26 : vector<8x1xf32>
    %c0_20 = arith.constant 0 : index
    %c0_21 = arith.constant 0 : index
    %c0_22 = arith.constant 0 : index
    %28 = vector.load %arg9[%c0_20, %c0_21, %c0_22] : memref<4x8x1xf32, #tpu.memory_space<vmem>>, vector<1x8x1xf32>
    %29 = vector.shape_cast %28 : vector<1x8x1xf32> to vector<8x1xf32>
    %30 = vector.shape_cast %27 : vector<8x1xf32> to vector<1x8x1xf32>
    tpu.vector_store %arg9[%c0_20, %c0_21, %c0_22], %30 {strides = array<i32>} : memref<4x8x1xf32, #tpu.memory_space<vmem>>, vector<1x8x1xf32>,
    %c0_23 = arith.constant 0 : index
    %c0_24 = arith.constant 0 : index
    %c0_25 = arith.constant 0 : index
    %31 = vector.load %arg8[%c0_23, %c0_24, %c0_25] : memref<4x8x1xf32, #tpu.memory_space<vmem>>, vector<1x8x1xf32>
    %32 = vector.shape_cast %31 : vector<1x8x1xf32> to vector<8x1xf32>
    %33 = vector.shape_cast %18 : vector<8x1xf32> to vector<1x8x1xf32>
    tpu.vector_store %arg8[%c0_23, %c0_24, %c0_25], %33 {strides = array<i32>} : memref<4x8x1xf32, #tpu.memory_space<vmem>>, vector<1x8x1xf32>,
    %c0_26 = arith.constant 0 : index
    %c0_27 = arith.constant 0 : index
    %c0_28 = arith.constant 0 : index
    %34 = vector.load %arg7[%c0_26, %c0_27, %c0_28] : memref<4x8x8xf32, #tpu.memory_space<vmem>>, vector<1x8x8xf32>
    %35 = vector.shape_cast %34 : vector<1x8x8xf32> to vector<8x8xf32>
    %36 = vector.broadcast %20 : vector<8x1xf32> to vector<8x8xf32>
    %37 = arith.mulf %36, %35 : vector<8x8xf32>
    %38 = vector.extract_strided_slice %8 {offsets = [0, 0], sizes = [8, 8], strides = [1, 1]} : vector<8x32xf32> to vector<8x8xf32>
    %cst_29 = arith.constant dense<0.000000e+00> : vector<8x8xf32>
    %39 = tpu.matmul %23, %38, %cst_29 {dimension_numbers = #tpu.dot_dimension_numbers<[1], [0], [0], [1], [0, 0, 1, 1], [], []>} : vector<8x8xf32>, vector<8x8xf32>, vector<8x8xf32> -> vector<8x8xf32>
    %40 = arith.addf %37, %39 : vector<8x8xf32>
    %c0_30 = arith.constant 0 : index
    %c0_31 = arith.constant 0 : index
    %c0_32 = arith.constant 0 : index
    %41 = vector.load %arg7[%c0_30, %c0_31, %c0_32] : memref<4x8x8xf32, #tpu.memory_space<vmem>>, vector<1x8x8xf32>
    %42 = vector.shape_cast %41 : vector<1x8x8xf32> to vector<8x8xf32>
    %43 = vector.shape_cast %40 : vector<8x8xf32> to vector<1x8x8xf32>
    tpu.vector_store %arg7[%c0_30, %c0_31, %c0_32], %43 {strides = array<i32>} : memref<4x8x8xf32, #tpu.memory_space<vmem>>, vector<1x8x8xf32>,
    %44 = vector.extract_strided_slice %4 {offsets = [0, 8], sizes = [8, 8], strides = [1, 1]} : vector<8x32xf32> to vector<8x8xf32>
    %45 = vector.extract_strided_slice %6 {offsets = [0, 8], sizes = [8, 8], strides = [1, 1]} : vector<8x32xf32> to vector<8x8xf32>
    %cst_33 = arith.constant dense<0.000000e+00> : vector<8x8xf32>
    %46 = tpu.matmul %44, %45, %cst_33 {dimension_numbers = #tpu.dot_dimension_numbers<[1], [1], [0], [0], [0, 0, 1, 0], [], []>} : vector<8x8xf32>, vector<8x8xf32>, vector<8x8xf32> -> vector<8x8xf32>
    %c1 = arith.constant 1 : index
    %c0_34 = arith.constant 0 : index
    %c0_35 = arith.constant 0 : index
    %47 = vector.load %arg8[%c1, %c0_34, %c0_35] : memref<4x8x1xf32, #tpu.memory_space<vmem>>, vector<1x8x1xf32>
    %48 = vector.shape_cast %47 : vector<1x8x1xf32> to vector<8x1xf32>
    %c1_36 = arith.constant 1 : index
    %c0_37 = arith.constant 0 : index
    %c0_38 = arith.constant 0 : index
    %49 = vector.load %arg9[%c1_36, %c0_37, %c0_38] : memref<4x8x1xf32, #tpu.memory_space<vmem>>, vector<1x8x1xf32>
    %50 = vector.shape_cast %49 : vector<1x8x1xf32> to vector<8x1xf32>
    %cst_39 = arith.constant dense<0xFF800000> : vector<8xf32>
    %51 = vector.multi_reduction <maximumf>, %46, %cst_39 [1] : vector<8x8xf32> to vector<8xf32>
    %52 = vector.shape_cast %51 : vector<8xf32> to vector<8x1xf32>
    %53 = arith.maximumf %48, %52 : vector<8x1xf32>
    %54 = arith.subf %48, %53 : vector<8x1xf32>
    %55 = math.exp %54 : vector<8x1xf32>
    %56 = vector.broadcast %53 : vector<8x1xf32> to vector<8x8xf32>
    %57 = arith.subf %46, %56 : vector<8x8xf32>
    %58 = math.exp %57 : vector<8x8xf32>
    %59 = arith.mulf %55, %50 : vector<8x1xf32>
    %cst_40 = arith.constant dense<0.000000e+00> : vector<8xf32>
    %60 = vector.multi_reduction <add>, %58, %cst_40 [1] : vector<8x8xf32> to vector<8xf32>
    %61 = vector.shape_cast %60 : vector<8xf32> to vector<8x1xf32>
    %62 = arith.addf %59, %61 : vector<8x1xf32>
    %c1_41 = arith.constant 1 : index
    %c0_42 = arith.constant 0 : index
    %c0_43 = arith.constant 0 : index
    %63 = vector.load %arg9[%c1_41, %c0_42, %c0_43] : memref<4x8x1xf32, #tpu.memory_space<vmem>>, vector<1x8x1xf32>
    %64 = vector.shape_cast %63 : vector<1x8x1xf32> to vector<8x1xf32>
    %65 = vector.shape_cast %62 : vector<8x1xf32> to vector<1x8x1xf32>
    tpu.vector_store %arg9[%c1_41, %c0_42, %c0_43], %65 {strides = array<i32>} : memref<4x8x1xf32, #tpu.memory_space<vmem>>, vector<1x8x1xf32>,
    %c1_44 = arith.constant 1 : index
    %c0_45 = arith.constant 0 : index
    %c0_46 = arith.constant 0 : index
    %66 = vector.load %arg8[%c1_44, %c0_45, %c0_46] : memref<4x8x1xf32, #tpu.memory_space<vmem>>, vector<1x8x1xf32>
    %67 = vector.shape_cast %66 : vector<1x8x1xf32> to vector<8x1xf32>
    %68 = vector.shape_cast %53 : vector<8x1xf32> to vector<1x8x1xf32>
    tpu.vector_store %arg8[%c1_44, %c0_45, %c0_46], %68 {strides = array<i32>} : memref<4x8x1xf32, #tpu.memory_space<vmem>>, vector<1x8x1xf32>,
    %c1_47 = arith.constant 1 : index
    %c0_48 = arith.constant 0 : index
    %c0_49 = arith.constant 0 : index
    %69 = vector.load %arg7[%c1_47, %c0_48, %c0_49] : memref<4x8x8xf32, #tpu.memory_space<vmem>>, vector<1x8x8xf32>
    %70 = vector.shape_cast %69 : vector<1x8x8xf32> to vector<8x8xf32>
    %71 = vector.broadcast %55 : vector<8x1xf32> to vector<8x8xf32>
    %72 = arith.mulf %71, %70 : vector<8x8xf32>
    %73 = vector.extract_strided_slice %8 {offsets = [0, 8], sizes = [8, 8], strides = [1, 1]} : vector<8x32xf32> to vector<8x8xf32>
    %cst_50 = arith.constant dense<0.000000e+00> : vector<8x8xf32>
    %74 = tpu.matmul %58, %73, %cst_50 {dimension_numbers = #tpu.dot_dimension_numbers<[1], [0], [0], [1], [0, 0, 1, 1], [], []>} : vector<8x8xf32>, vector<8x8xf32>, vector<8x8xf32> -> vector<8x8xf32>
    %75 = arith.addf %72, %74 : vector<8x8xf32>
    %c1_51 = arith.constant 1 : index
    %c0_52 = arith.constant 0 : index
    %c0_53 = arith.constant 0 : index
    %76 = vector.load %arg7[%c1_51, %c0_52, %c0_53] : memref<4x8x8xf32, #tpu.memory_space<vmem>>, vector<1x8x8xf32>
    %77 = vector.shape_cast %76 : vector<1x8x8xf32> to vector<8x8xf32>
    %78 = vector.shape_cast %75 : vector<8x8xf32> to vector<1x8x8xf32>
    tpu.vector_store %arg7[%c1_51, %c0_52, %c0_53], %78 {strides = array<i32>} : memref<4x8x8xf32, #tpu.memory_space<vmem>>, vector<1x8x8xf32>,
    %79 = vector.extract_strided_slice %4 {offsets = [0, 16], sizes = [8, 8], strides = [1, 1]} : vector<8x32xf32> to vector<8x8xf32>
    %80 = vector.extract_strided_slice %6 {offsets = [0, 16], sizes = [8, 8], strides = [1, 1]} : vector<8x32xf32> to vector<8x8xf32>
    %cst_54 = arith.constant dense<0.000000e+00> : vector<8x8xf32>
    %81 = tpu.matmul %79, %80, %cst_54 {dimension_numbers = #tpu.dot_dimension_numbers<[1], [1], [0], [0], [0, 0, 1, 0], [], []>} : vector<8x8xf32>, vector<8x8xf32>, vector<8x8xf32> -> vector<8x8xf32>
    %c2 = arith.constant 2 : index
    %c0_55 = arith.constant 0 : index
    %c0_56 = arith.constant 0 : index
    %82 = vector.load %arg8[%c2, %c0_55, %c0_56] : memref<4x8x1xf32, #tpu.memory_space<vmem>>, vector<1x8x1xf32>
    %83 = vector.shape_cast %82 : vector<1x8x1xf32> to vector<8x1xf32>
    %c2_57 = arith.constant 2 : index
    %c0_58 = arith.constant 0 : index
    %c0_59 = arith.constant 0 : index
    %84 = vector.load %arg9[%c2_57, %c0_58, %c0_59] : memref<4x8x1xf32, #tpu.memory_space<vmem>>, vector<1x8x1xf32>
    %85 = vector.shape_cast %84 : vector<1x8x1xf32> to vector<8x1xf32>
    %cst_60 = arith.constant dense<0xFF800000> : vector<8xf32>
    %86 = vector.multi_reduction <maximumf>, %81, %cst_60 [1] : vector<8x8xf32> to vector<8xf32>
    %87 = vector.shape_cast %86 : vector<8xf32> to vector<8x1xf32>
    %88 = arith.maximumf %83, %87 : vector<8x1xf32>
    %89 = arith.subf %83, %88 : vector<8x1xf32>
    %90 = math.exp %89 : vector<8x1xf32>
    %91 = vector.broadcast %88 : vector<8x1xf32> to vector<8x8xf32>
    %92 = arith.subf %81, %91 : vector<8x8xf32>
    %93 = math.exp %92 : vector<8x8xf32>
    %94 = arith.mulf %90, %85 : vector<8x1xf32>
    %cst_61 = arith.constant dense<0.000000e+00> : vector<8xf32>
    %95 = vector.multi_reduction <add>, %93, %cst_61 [1] : vector<8x8xf32> to vector<8xf32>
    %96 = vector.shape_cast %95 : vector<8xf32> to vector<8x1xf32>
    %97 = arith.addf %94, %96 : vector<8x1xf32>
    %c2_62 = arith.constant 2 : index
    %c0_63 = arith.constant 0 : index
    %c0_64 = arith.constant 0 : index
    %98 = vector.load %arg9[%c2_62, %c0_63, %c0_64] : memref<4x8x1xf32, #tpu.memory_space<vmem>>, vector<1x8x1xf32>
    %99 = vector.shape_cast %98 : vector<1x8x1xf32> to vector<8x1xf32>
    %100 = vector.shape_cast %97 : vector<8x1xf32> to vector<1x8x1xf32>
    tpu.vector_store %arg9[%c2_62, %c0_63, %c0_64], %100 {strides = array<i32>} : memref<4x8x1xf32, #tpu.memory_space<vmem>>, vector<1x8x1xf32>,
    %c2_65 = arith.constant 2 : index
    %c0_66 = arith.constant 0 : index
    %c0_67 = arith.constant 0 : index
    %101 = vector.load %arg8[%c2_65, %c0_66, %c0_67] : memref<4x8x1xf32, #tpu.memory_space<vmem>>, vector<1x8x1xf32>
    %102 = vector.shape_cast %101 : vector<1x8x1xf32> to vector<8x1xf32>
    %103 = vector.shape_cast %88 : vector<8x1xf32> to vector<1x8x1xf32>
    tpu.vector_store %arg8[%c2_65, %c0_66, %c0_67], %103 {strides = array<i32>} : memref<4x8x1xf32, #tpu.memory_space<vmem>>, vector<1x8x1xf32>,
    %c2_68 = arith.constant 2 : index
    %c0_69 = arith.constant 0 : index
    %c0_70 = arith.constant 0 : index
    %104 = vector.load %arg7[%c2_68, %c0_69, %c0_70] : memref<4x8x8xf32, #tpu.memory_space<vmem>>, vector<1x8x8xf32>
    %105 = vector.shape_cast %104 : vector<1x8x8xf32> to vector<8x8xf32>
    %106 = vector.broadcast %90 : vector<8x1xf32> to vector<8x8xf32>
    %107 = arith.mulf %106, %105 : vector<8x8xf32>
    %108 = vector.extract_strided_slice %8 {offsets = [0, 16], sizes = [8, 8], strides = [1, 1]} : vector<8x32xf32> to vector<8x8xf32>
    %cst_71 = arith.constant dense<0.000000e+00> : vector<8x8xf32>
    %109 = tpu.matmul %93, %108, %cst_71 {dimension_numbers = #tpu.dot_dimension_numbers<[1], [0], [0], [1], [0, 0, 1, 1], [], []>} : vector<8x8xf32>, vector<8x8xf32>, vector<8x8xf32> -> vector<8x8xf32>
    %110 = arith.addf %107, %109 : vector<8x8xf32>
    %c2_72 = arith.constant 2 : index
    %c0_73 = arith.constant 0 : index
    %c0_74 = arith.constant 0 : index
    %111 = vector.load %arg7[%c2_72, %c0_73, %c0_74] : memref<4x8x8xf32, #tpu.memory_space<vmem>>, vector<1x8x8xf32>
    %112 = vector.shape_cast %111 : vector<1x8x8xf32> to vector<8x8xf32>
    %113 = vector.shape_cast %110 : vector<8x8xf32> to vector<1x8x8xf32>
    tpu.vector_store %arg7[%c2_72, %c0_73, %c0_74], %113 {strides = array<i32>} : memref<4x8x8xf32, #tpu.memory_space<vmem>>, vector<1x8x8xf32>,
    %114 = vector.extract_strided_slice %4 {offsets = [0, 24], sizes = [8, 8], strides = [1, 1]} : vector<8x32xf32> to vector<8x8xf32>
    %115 = vector.extract_strided_slice %6 {offsets = [0, 24], sizes = [8, 8], strides = [1, 1]} : vector<8x32xf32> to vector<8x8xf32>
    %cst_75 = arith.constant dense<0.000000e+00> : vector<8x8xf32>
    %116 = tpu.matmul %114, %115, %cst_75 {dimension_numbers = #tpu.dot_dimension_numbers<[1], [1], [0], [0], [0, 0, 1, 0], [], []>} : vector<8x8xf32>, vector<8x8xf32>, vector<8x8xf32> -> vector<8x8xf32>
    %c3 = arith.constant 3 : index
    %c0_76 = arith.constant 0 : index
    %c0_77 = arith.constant 0 : index
    %117 = vector.load %arg8[%c3, %c0_76, %c0_77] : memref<4x8x1xf32, #tpu.memory_space<vmem>>, vector<1x8x1xf32>
    %118 = vector.shape_cast %117 : vector<1x8x1xf32> to vector<8x1xf32>
    %c3_78 = arith.constant 3 : index
    %c0_79 = arith.constant 0 : index
    %c0_80 = arith.constant 0 : index
    %119 = vector.load %arg9[%c3_78, %c0_79, %c0_80] : memref<4x8x1xf32, #tpu.memory_space<vmem>>, vector<1x8x1xf32>
    %120 = vector.shape_cast %119 : vector<1x8x1xf32> to vector<8x1xf32>
    %cst_81 = arith.constant dense<0xFF800000> : vector<8xf32>
    %121 = vector.multi_reduction <maximumf>, %116, %cst_81 [1] : vector<8x8xf32> to vector<8xf32>
    %122 = vector.shape_cast %121 : vector<8xf32> to vector<8x1xf32>
    %123 = arith.maximumf %118, %122 : vector<8x1xf32>
    %124 = arith.subf %118, %123 : vector<8x1xf32>
    %125 = math.exp %124 : vector<8x1xf32>
    %126 = vector.broadcast %123 : vector<8x1xf32> to vector<8x8xf32>
    %127 = arith.subf %116, %126 : vector<8x8xf32>
    %128 = math.exp %127 : vector<8x8xf32>
    %129 = arith.mulf %125, %120 : vector<8x1xf32>
    %cst_82 = arith.constant dense<0.000000e+00> : vector<8xf32>
    %130 = vector.multi_reduction <add>, %128, %cst_82 [1] : vector<8x8xf32> to vector<8xf32>
    %131 = vector.shape_cast %130 : vector<8xf32> to vector<8x1xf32>
    %132 = arith.addf %129, %131 : vector<8x1xf32>
    %c3_83 = arith.constant 3 : index
    %c0_84 = arith.constant 0 : index
    %c0_85 = arith.constant 0 : index
    %133 = vector.load %arg9[%c3_83, %c0_84, %c0_85] : memref<4x8x1xf32, #tpu.memory_space<vmem>>, vector<1x8x1xf32>
    %134 = vector.shape_cast %133 : vector<1x8x1xf32> to vector<8x1xf32>
    %135 = vector.shape_cast %132 : vector<8x1xf32> to vector<1x8x1xf32>
    tpu.vector_store %arg9[%c3_83, %c0_84, %c0_85], %135 {strides = array<i32>} : memref<4x8x1xf32, #tpu.memory_space<vmem>>, vector<1x8x1xf32>,
    %c3_86 = arith.constant 3 : index
    %c0_87 = arith.constant 0 : index
    %c0_88 = arith.constant 0 : index
    %136 = vector.load %arg8[%c3_86, %c0_87, %c0_88] : memref<4x8x1xf32, #tpu.memory_space<vmem>>, vector<1x8x1xf32>
    %137 = vector.shape_cast %136 : vector<1x8x1xf32> to vector<8x1xf32>
    %138 = vector.shape_cast %123 : vector<8x1xf32> to vector<1x8x1xf32>
    tpu.vector_store %arg8[%c3_86, %c0_87, %c0_88], %138 {strides = array<i32>} : memref<4x8x1xf32, #tpu.memory_space<vmem>>, vector<1x8x1xf32>,
    %c3_89 = arith.constant 3 : index
    %c0_90 = arith.constant 0 : index
    %c0_91 = arith.constant 0 : index
    %139 = vector.load %arg7[%c3_89, %c0_90, %c0_91] : memref<4x8x8xf32, #tpu.memory_space<vmem>>, vector<1x8x8xf32>
    %140 = vector.shape_cast %139 : vector<1x8x8xf32> to vector<8x8xf32>
    %141 = vector.broadcast %125 : vector<8x1xf32> to vector<8x8xf32>
    %142 = arith.mulf %141, %140 : vector<8x8xf32>
    %143 = vector.extract_strided_slice %8 {offsets = [0, 24], sizes = [8, 8], strides = [1, 1]} : vector<8x32xf32> to vector<8x8xf32>
    %cst_92 = arith.constant dense<0.000000e+00> : vector<8x8xf32>
    %144 = tpu.matmul %128, %143, %cst_92 {dimension_numbers = #tpu.dot_dimension_numbers<[1], [0], [0], [1], [0, 0, 1, 1], [], []>} : vector<8x8xf32>, vector<8x8xf32>, vector<8x8xf32> -> vector<8x8xf32>
    %145 = arith.addf %142, %144 : vector<8x8xf32>
    %c3_93 = arith.constant 3 : index
    %c0_94 = arith.constant 0 : index
    %c0_95 = arith.constant 0 : index
    %146 = vector.load %arg7[%c3_93, %c0_94, %c0_95] : memref<4x8x8xf32, #tpu.memory_space<vmem>>, vector<1x8x8xf32>
    %147 = vector.shape_cast %146 : vector<1x8x8xf32> to vector<8x8xf32>
    %148 = vector.shape_cast %145 : vector<8x8xf32> to vector<1x8x8xf32>
    tpu.vector_store %arg7[%c3_93, %c0_94, %c0_95], %148 {strides = array<i32>} : memref<4x8x8xf32, #tpu.memory_space<vmem>>, vector<1x8x8xf32>,
    %c0_i32_96 = arith.constant 0 : i32
    %149 = arith.cmpi eq, %arg2, %c0_i32_96 : i32
    %150 = arith.extui %149 : i1 to i32
    %c0_i32_97 = arith.constant 0 : i32
    %151 = arith.cmpi ne, %150, %c0_i32_97 : i32
    scf.if %151 {
      %c0_98 = arith.constant 0 : index
      %c0_99 = arith.constant 0 : index
      %c0_100 = arith.constant 0 : index
      %152 = vector.load %arg7[%c0_98, %c0_99, %c0_100] : memref<4x8x8xf32, #tpu.memory_space<vmem>>, vector<1x8x8xf32>
      %153 = vector.shape_cast %152 : vector<1x8x8xf32> to vector<8x8xf32>
      %c0_101 = arith.constant 0 : index
      %c0_102 = arith.constant 0 : index
      %c0_103 = arith.constant 0 : index
      %154 = vector.load %arg9[%c0_101, %c0_102, %c0_103] : memref<4x8x1xf32, #tpu.memory_space<vmem>>, vector<1x8x1xf32>
      %155 = vector.shape_cast %154 : vector<1x8x1xf32> to vector<8x1xf32>
      %156 = vector.broadcast %155 : vector<8x1xf32> to vector<8x8xf32>
      %157 = arith.divf %153, %156 : vector<8x8xf32>
      %c1_104 = arith.constant 1 : index
      %c0_105 = arith.constant 0 : index
      %c0_106 = arith.constant 0 : index
      %158 = vector.load %arg7[%c1_104, %c0_105, %c0_106] : memref<4x8x8xf32, #tpu.memory_space<vmem>>, vector<1x8x8xf32>
      %159 = vector.shape_cast %158 : vector<1x8x8xf32> to vector<8x8xf32>
      %c1_107 = arith.constant 1 : index
      %c0_108 = arith.constant 0 : index
      %c0_109 = arith.constant 0 : index
      %160 = vector.load %arg9[%c1_107, %c0_108, %c0_109] : memref<4x8x1xf32, #tpu.memory_space<vmem>>, vector<1x8x1xf32>
      %161 = vector.shape_cast %160 : vector<1x8x1xf32> to vector<8x1xf32>
      %162 = vector.broadcast %161 : vector<8x1xf32> to vector<8x8xf32>
      %163 = arith.divf %159, %162 : vector<8x8xf32>
      %c2_110 = arith.constant 2 : index
      %c0_111 = arith.constant 0 : index
      %c0_112 = arith.constant 0 : index
      %164 = vector.load %arg7[%c2_110, %c0_111, %c0_112] : memref<4x8x8xf32, #tpu.memory_space<vmem>>, vector<1x8x8xf32>
      %165 = vector.shape_cast %164 : vector<1x8x8xf32> to vector<8x8xf32>
      %c2_113 = arith.constant 2 : index
      %c0_114 = arith.constant 0 : index
      %c0_115 = arith.constant 0 : index
      %166 = vector.load %arg9[%c2_113, %c0_114, %c0_115] : memref<4x8x1xf32, #tpu.memory_space<vmem>>, vector<1x8x1xf32>
      %167 = vector.shape_cast %166 : vector<1x8x1xf32> to vector<8x1xf32>
      %168 = vector.broadcast %167 : vector<8x1xf32> to vector<8x8xf32>
      %169 = arith.divf %165, %168 : vector<8x8xf32>
      %c3_116 = arith.constant 3 : index
      %c0_117 = arith.constant 0 : index
      %c0_118 = arith.constant 0 : index
      %170 = vector.load %arg7[%c3_116, %c0_117, %c0_118] : memref<4x8x8xf32, #tpu.memory_space<vmem>>, vector<1x8x8xf32>
      %171 = vector.shape_cast %170 : vector<1x8x8xf32> to vector<8x8xf32>
      %c3_119 = arith.constant 3 : index
      %c0_120 = arith.constant 0 : index
      %c0_121 = arith.constant 0 : index
      %172 = vector.load %arg9[%c3_119, %c0_120, %c0_121] : memref<4x8x1xf32, #tpu.memory_space<vmem>>, vector<1x8x1xf32>
      %173 = vector.shape_cast %172 : vector<1x8x1xf32> to vector<8x1xf32>
      %174 = vector.broadcast %173 : vector<8x1xf32> to vector<8x8xf32>
      %175 = arith.divf %171, %174 : vector<8x8xf32>
      %176 = tpu.concatenate %157, %163, %169, %175 in 1 : vector<8x8xf32>, vector<8x8xf32>, vector<8x8xf32>, vector<8x8xf32> -> vector<8x32xf32>
      %c0_122 = arith.constant 0 : index
      %c0_123 = arith.constant 0 : index
      %c0_124 = arith.constant 0 : index
      %177 = vector.load %arg6[%c0_122, %c0_123, %c0_124] : memref<1x8x32xf32, #tpu.memory_space<vmem>>, vector<1x8x32xf32>
      %178 = vector.shape_cast %177 : vector<1x8x32xf32> to vector<8x32xf32>
      %179 = vector.shape_cast %176 : vector<8x32xf32> to vector<1x8x32xf32>
      tpu.vector_store %arg6[%c0_122, %c0_123, %c0_124], %179 {strides = array<i32>} : memref<1x8x32xf32, #tpu.memory_space<vmem>>, vector<1x8x32xf32>,
    } else {
    }
    return
  }
  func.func @transform_0(%arg0: i32, %arg1: i32, %arg2: i32) -> (i32, i32, i32, i32) {
    %c0_i32 = arith.constant 0 : i32
    %c0_i32_0 = arith.constant 0 : i32
    %c0_i32_1 = arith.constant 0 : i32
    return %c0_i32, %arg0, %arg1, %c0_i32_0 : i32, i32, i32, i32
  }
  func.func @transform_1(%arg0: i32, %arg1: i32, %arg2: i32) -> (i32, i32, i32, i32) {
    %c1_i32 = arith.constant 1 : i32
    %c0_i32 = arith.constant 0 : i32
    %c0_i32_0 = arith.constant 0 : i32
    return %c1_i32, %arg0, %arg2, %c0_i32 : i32, i32, i32, i32
  }
  func.func @transform_2(%arg0: i32, %arg1: i32, %arg2: i32) -> (i32, i32, i32, i32) {
    %c2_i32 = arith.constant 2 : i32
    %c0_i32 = arith.constant 0 : i32
    %c0_i32_0 = arith.constant 0 : i32
    return %c2_i32, %arg0, %arg2, %c0_i32 : i32, i32, i32, i32
  }
  func.func @transform_3(%arg0: i32, %arg1: i32, %arg2: i32) -> (i32, i32, i32) {
    %c0_i32 = arith.constant 0 : i32
    %c0_i32_0 = arith.constant 0 : i32
    return %arg0, %arg1, %c0_i32 : i32, i32, i32
  }
}

</mosaic_0001>

<bundles_post_ra>
// kernel: tile.10
= control target key start
LH: loop header
LB: loop body
LE: loop exit
PB: predicated region body
PF: predicated region fallthrough
CT: control target
= control target key end

     0   :  { %s154_s0 = inlined_call_operand.vmem [shape: f32[8,8], index: 0, kind: input, shape index: {}]   ;;  %s155_s1 = inlined_call_operand.vmem [shape: f32[2,8,4,8], index: 1, kind: output, shape index: {}]  }
   0x1   :  { %v4_v0 = vld [vmem:[%s154_s0] ss:$0 sm:$0xff]  ;;  %v51_v1 = vld [vmem:[%s154_s0 + $0x1] ss:$0 sm:$0xff]  ;;  %v54_v2 = vld [vmem:[%s154_s0 + $0x2] ss:$0 sm:$0xff] }
   0x2   :  { %5 = vst [vmem:[%s155_s1] sm:$0xf] %v4_v0  ;;  %50 = vst [vmem:[%s155_s1 + $0x20] sm:$0xf] %v4_v0  ;;  %v57_v3 = vld [vmem:[%s154_s0 + $0x3] ss:$0 sm:$0xff] }
   0x3   :  { %52 = vst [vmem:[%s155_s1 + $0x4] sm:$0xf] %v51_v1  ;;  %53 = vst [vmem:[%s155_s1 + $0x24] sm:$0xf] %v51_v1  ;;  %v60_v4 = vld [vmem:[%s154_s0 + $0x4] ss:$0 sm:$0xff] }
   0x4   :  { %55 = vst [vmem:[%s155_s1 + $0x8] sm:$0xf] %v54_v2  ;;  %56 = vst [vmem:[%s155_s1 + $0x28] sm:$0xf] %v54_v2  ;;  %v63_v5 = vld [vmem:[%s154_s0 + $0x5] ss:$0 sm:$0xff] }
   0x5   :  { %58 = vst [vmem:[%s155_s1 + $0xc] sm:$0xf] %v57_v3  ;;  %59 = vst [vmem:[%s155_s1 + $0x2c] sm:$0xf] %v57_v3  ;;  %v66_v6 = vld [vmem:[%s154_s0 + $0x6] ss:$0 sm:$0xff] }
   0x6   :  { %61 = vst [vmem:[%s155_s1 + $0x10] sm:$0xf] %v60_v4  ;;  %62 = vst [vmem:[%s155_s1 + $0x30] sm:$0xf] %v60_v4  ;;  %v69_v7 = vld [vmem:[%s154_s0 + $0x7] ss:$0 sm:$0xff] }
   0x7   :  { %64 = vst [vmem:[%s155_s1 + $0x14] sm:$0xf] %v63_v5  ;;  %65 = vst [vmem:[%s155_s1 + $0x34] sm:$0xf] %v63_v5 }
   0x8   :  { %67 = vst [vmem:[%s155_s1 + $0x18] sm:$0xf] %v66_v6  ;;  %68 = vst [vmem:[%s155_s1 + $0x38] sm:$0xf] %v66_v6 }
   0x9   :  { %70 = vst [vmem:[%s155_s1 + $0x1c] sm:$0xf] %v69_v7  ;;  %71 = vst [vmem:[%s155_s1 + $0x3c] sm:$0xf] %v69_v7 }

// kernel: tile.11
= control target key start
LH: loop header
LB: loop body
LE: loop exit
PB: predicated region body
PF: predicated region fallthrough
CT: control target
= control target key end

     0   :  { %vm83_vm0 = vcmask 1047556   ;;  %vm85_vm1 = vcmask 64512   ;;  %s196_s9 = smov 24   ;;  %s197_s14 = smov 8   ;;  %vm104_vm2 = vcmask 261312   ;;  %vm125_vm3 = vcmask 195712   ;;  %s290_s0 = inlined_call_operand.vmem [shape: f32[2,8,4,8], index: 0, kind: input, shape index: {}]   ;;  %s291_s1 = inlined_call_operand.vmem [shape: f32[16,32], index: 1, kind: output, shape index: {}]  }
   0x1   :  { %v181_v0 = vld [vmem:[%s290_s0 + $0x1c] sm:$0xf]  ;;  %v182_v1 = vld [vmem:[%s290_s0 + $0x18] sm:$0xf]  ;;  %v183_v2 = vld [vmem:[%s290_s0 + $0x14] sm:$0xf] }
   0x2   :  { %49 = vst [vmem:[#allocation0 + $0x38] sm:$0xf] %v181_v0  ;;  %54 = vst [vmem:[#allocation0 + $0x30] sm:$0xf] %v182_v1  ;;  %v184_v3 = vld [vmem:[%s290_s0 + $0x10] sm:$0xf] }
   0x3   :  { %59 = vst [vmem:[#allocation0 + $0x28] sm:$0xf] %v183_v2  ;;  %v185_v4 = vld [vmem:[%s290_s0 + $0xc] sm:$0xf]  ;;  %v186_v5 = vld [vmem:[%s290_s0 + $0x8] sm:$0xf] }
   0x4   :  { %64 = vst [vmem:[#allocation0 + $0x20] sm:$0xf] %v184_v3  ;;  %69 = vst [vmem:[#allocation0 + $0x18] sm:$0xf] %v185_v4  ;;  %v187_v6 = vld [vmem:[%s290_s0 + $0x4] sm:$0xf] }
   0x5   :  { %74 = vst [vmem:[#allocation0 + $0x10] sm:$0xf] %v186_v5  ;;  %v79_v7 = vld [vmem:[%s290_s0] sm:$0xf]  ;;  %78 = vst [vmem:[#allocation0 + $0x8] sm:$0xf] %v187_v6 }
   0x6   :  { %80 = vst [vmem:[#allocation0] sm:$0xf] %v79_v7  ;;  %v173_v8 = vld [vmem:[%s290_s0 + $0x3c] sm:$0xf]  ;;  %v174_v9 = vld [vmem:[%s290_s0 + $0x38] sm:$0xf] }
   0x7   :  { %9 = vst [vmem:[#allocation0 + $0x78] sm:$0xf] %v173_v8  ;;  %14 = vst [vmem:[#allocation0 + $0x70] sm:$0xf] %v174_v9  ;;  %v175_v10 = vld [vmem:[%s290_s0 + $0x34] sm:$0xf] }
   0x8   :  { %v176_v11 = vld [vmem:[%s290_s0 + $0x30] sm:$0xf]  ;;  %v177_v12 = vld [vmem:[%s290_s0 + $0x2c] sm:$0xf]  ;;  %19 = vst [vmem:[#allocation0 + $0x68] sm:$0xf] %v175_v10 }
   0x9   :  { %24 = vst [vmem:[#allocation0 + $0x60] sm:$0xf] %v176_v11  ;;  %29 = vst [vmem:[#allocation0 + $0x58] sm:$0xf] %v177_v12  ;;  %v178_v13 = vld [vmem:[%s290_s0 + $0x28] sm:$0xf] }
   0xa   :  { %v179_v14 = vld [vmem:[%s290_s0 + $0x24] sm:$0xf]  ;;  %v180_v15 = vld [vmem:[%s290_s0 + $0x20] sm:$0xf]  ;;  %34 = vst [vmem:[#allocation0 + $0x50] sm:$0xf] %v178_v13 }
   0xb   :  { %39 = vst [vmem:[#allocation0 + $0x48] sm:$0xf] %v179_v14  ;;  %44 = vst [vmem:[#allocation0 + $0x40] sm:$0xf] %v180_v15  ;;  %s195_s0 = smov 16   ;;  %vm146_vm4 = vcmask 130112  }
   0xc   :  { %v120_v16 = vld [vmem:[#allocation0 + $0x2] ss:$8 sm:$0xf0]   ;;  %v99_v17 = vld [vmem:[#allocation0 + $0x3] ss:$8 sm:$0xf0]  }
   0xd   :  { %v118_v18 = vld [vmem:[#allocation0 + $0x2] ss:$8 sm:$0xf]   ;;  %v97_v19 = vld [vmem:[#allocation0 + $0x3] ss:$8 sm:$0xf]  }
   0xe   :  { %v122_v20 = vsel %vm83_vm0, %v120_v16, %v118_v18  ;;  %v101_v21 = vsel %vm83_vm0, %v99_v17, %v97_v19  ;;  %v139_v24 = vld [vmem:[#allocation0 + $0x1] ss:$8 sm:$0xf]   ;;  %v81_v32 = vld [vmem:[#allocation0] ss:$8 sm:$0xf]  }
   0xf   :  { %123 = vrot.lane.b32.xlu1 %v122_v20, %s195_s0  ;;  %102 = vrot.lane.b32.xlu0 %v101_v21, %s196_s9  ;;  %v141_v25 = vld [vmem:[#allocation0 + $0x1] ss:$8 sm:$0xf0]   ;;  %v82_v33 = vld [vmem:[#allocation0] ss:$8 sm:$0xf0]  }
  0x10   :  { %v130_v22 = vld [vmem:[#allocation0 + $0x42] ss:$8 sm:$0xf0]   ;;  %v109_v23 = vld [vmem:[#allocation0 + $0x43] ss:$8 sm:$0xf0]   ;;  %v84_v34 = vsel %vm83_vm0, %v82_v33, %v81_v32  ;;  %v143_v38 = vsel %vm83_vm0, %v141_v25, %v139_v24 }
  0x11   :  { %v151_v31 = vld [vmem:[#allocation0 + $0x41] ss:$8 sm:$0xf0]   ;;  %v90_v36 = vld [vmem:[#allocation0 + $0x40] ss:$8 sm:$0xf0]  }
  0x12   :  { %v128_v26 = vld [vmem:[#allocation0 + $0x42] ss:$8 sm:$0xf]   ;;  %v107_v27 = vld [vmem:[#allocation0 + $0x43] ss:$8 sm:$0xf]  }
  0x13   :  { %v132_v28 = vsel %vm83_vm0, %v130_v22, %v128_v26  ;;  %v111_v29 = vsel %vm83_vm0, %v109_v23, %v107_v27  ;;  %v149_v30 = vld [vmem:[#allocation0 + $0x41] ss:$8 sm:$0xf]   ;;  %v88_v35 = vld [vmem:[#allocation0 + $0x40] ss:$8 sm:$0xf]  }
  0x14   :  { %133 = vrot.lane.b32.xlu1 %v132_v28, %s195_s0  ;;  %112 = vrot.lane.b32.xlu0 %v111_v29, %s196_s9  ;;  %v153_v37 = vsel %vm83_vm0, %v151_v31, %v149_v30  ;;  %86 = vst.msk [vmem:[%s291_s1] sm:$0xff] %vm85_vm1, %v84_v34   ;;  %v92_v39 = vsel %vm83_vm0, %v90_v36, %v88_v35 }
  0x15   :  { %188 = vst.msk [vmem:[%s291_s1 + $0x8] sm:$0xff] %vm85_vm1, %v92_v39  }
  0x18   :  { %154 = vrot.lane.b32.xlu1 %v153_v37, %s197_s14  ;;  %144 = vrot.lane.b32.xlu0 %v143_v38, %s197_s14 }
  0x81   :  { %v124_v40 = vpop.permute.xlu1 %123   ;;  %v103_v41 = vpop.permute.xlu0 %102  }
  0x82   :  { %105 = vst.msk [vmem:[%s291_s1] sm:$0xff] %vm104_vm2, %v103_v41  }
  0x83   :  { %126 = vst.msk [vmem:[%s291_s1] sm:$0xff] %vm125_vm3, %v124_v40  }
  0x86   :  { %v134_v42 = vpop.permute.xlu1 %133   ;;  %v113_v43 = vpop.permute.xlu0 %112  }
  0x87   :  { %189 = vst.msk [vmem:[%s291_s1 + $0x8] sm:$0xff] %vm104_vm2, %v113_v43  }
  0x88   :  { %190 = vst.msk [vmem:[%s291_s1 + $0x8] sm:$0xff] %vm125_vm3, %v134_v42  }
  0x8a   :  { %v155_v44 = vpop.permute.xlu1 %154   ;;  %v145_v45 = vpop.permute.xlu0 %144  }
  0x8b   :  { %191 = vst.msk [vmem:[%s291_s1 + $0x8] sm:$0xff] %vm146_vm4, %v155_v44   ;;  %147 = vst.msk [vmem:[%s291_s1] sm:$0xff] %vm146_vm4, %v145_v45  }

// kernel: multi_headed_attention.3
= control target key start
LH: loop header
LB: loop body
LE: loop exit
PB: predicated region body
PF: predicated region fallthrough
CT: control target
= control target key end

     0   :  { %s900_s18 = smov 0   ;;  %s902_s19 = smov 0   ;;  %s994_s0 = inlined_call_operand.vmem [shape: f32[16,32], index: 0, kind: input, shape index: {}]   ;;  %s995_s1 = inlined_call_operand.vmem [shape: f32[3,32,32], index: 1, kind: input, shape index: {}]   ;;  %s996_s2 = inlined_call_operand.vmem [shape: f32[3,1,32], index: 2, kind: input, shape index: {}]   ;;  %s997_s3 = inlined_call_operand.vmem [shape: f32[16,32], index: 3, kind: input, shape index: {}]   ;;  %s998_s4 = inlined_call_operand.vmem [shape: f32[16,32], index: 4, kind: input, shape index: {}]   ;;  %s999_s5 = inlined_call_operand.vmem [shape: f32[3,16,32], index: 5, kind: output, shape index: {}]  }
   0x1   :  { %s904_s20 = smov 0  }
   0x2 LB: > { %s33_s21 = sadd.s32 1, %s861_s19  ;;  %p782_p0 = scmp.ge.s32.totalorder %s865_s20, 1  ;;  %s865_s20 = sphi %s904_s20, %s15_s20   ;;  %s861_s19 = sphi %s902_s19, %s1001_s19   ;;  %s857_s18 = sphi %s900_s18, %s1000_s18  }
   0x3   : > { %p35_p1 = scmp.ge.s32.totalorder %s33_s21, 3  ;;  %p290_p2 = scmp.lt.s32.totalorder %s865_s20, 4 }
   0x5   : > { %s1003_s21 = smov (%p35_p1, %s33_s21), 0  ;;  %p291_p3 = pnand %p782_p0, %p290_p2 }
   0x6   : > { %p372_p4 = scmp.lt.s32.totalorder (!%p291_p3), %s857_s18, 2  ;;  %p522_p5 = scmp.le.s32.totalorder (!%p291_p3), %s857_s18, 1 }
   0x7   : > { %294 = sbr.rel (%p291_p3) target bundleno = 373 (0x175), region = 40 }
   0xc   : > { %vm425_vm0 = vcmask 261120   ;;  %v430_v0 = vld [vmem:[%s994_s0] sm:$0xff]  ;;  %v867_v1 = vmov 0.0   ;;  %s373_s24 = scalar_select %p372_p4, %s857_s18, 2  ;;  %v431_v6 = vld [vmem:[%s994_s0 + $0x8] sm:$0xff]  ;;  %vm552_vm1 = vcmask (%p522_p5), 31744  }
   0xd   : > { %813 = vmatprep.mubr.msk.f32.mxu0 %vm425_vm0, %v430_v0  ;;  %427 = vst.msk [vmem:[#allocation2 + $0x8] sm:$0xff] %vm425_vm0, %v867_v1  ;;  %426 = vst.msk [vmem:[#allocation2] sm:$0xff] %vm425_vm0, %v867_v1  ;;  %s868_s13 = smov (%p522_p5), 4   ;;  %s869_s14 = smov (%p522_p5), 124   ;;  %vm555_vm2 = vcmask (%p522_p5), 64512   ;;  %vm558_vm3 = vcmask (%p522_p5), 97280  }
   0xe   : > { %s795_s25 = sshll.u32 %s373_s24, 5  ;;  %s931_s28 = scalar_lea.vmem %s996_s2, %s373_s24  ;;  %vm561_vm4 = vcmask (%p522_p5), 130048   ;;  %vm564_vm5 = vcmask (%p522_p5), 162816   ;;  %v573_v22 = vld [vmem:[%s997_s3] sm:$0xff] (%p522_p5)  ;;  %vm567_vm6 = vcmask (%p522_p5), 195584   ;;  %vm570_vm7 = vcmask (%p522_p5), 228352  }
   0xf   : > { %s382_s6 = scalar_lea.vmem %s995_s1, %s795_s25  ;;  %s796_s7 = sshll.u32 %s373_s24, 4  ;;  %v790_v14 = vld [vmem:[%s931_s28] ss:$0 sm:$0xff] (%p522_p5)  ;;  %v574_v33 = vld [vmem:[%s997_s3 + $0x8] sm:$0xff] (%p522_p5) }
  0x10   : > { %s939_s10 = scalar_lea.vmem %s999_s5, %s796_s7  ;;  %v435_v2 = vld [vmem:[%s382_s6 + $0x18] sm:$0xff]  ;;  %v434_v3 = vld [vmem:[%s382_s6 + $0x10] sm:$0xff]  ;;  %v433_v4 = vld [vmem:[%s382_s6 + $0x8] sm:$0xff] }
  0x11   : > { %805 = vmatprep.subr.mxu0 %v435_v2  ;;  %v432_v5 = vld [vmem:[%s382_s6] sm:$0xff]  ;;  %v578_v38 = vld [vmem:[%s998_s4 + $0x8] sm:$0xff] (%p522_p5) }
  0x12   : > { %806 = vmatpush3.msra.mxu0 %v435_v2  ;;  %v577_v27 = vld [vmem:[%s998_s4] sm:$0xff] (%p522_p5) }
  0x13   : > { %807 = vmatprep.subr.mxu0 %v434_v3 }
  0x14   : > { %808 = vmatpush3.msra.mxu0 %v434_v3  ;;  %v429_v7 = vld [vmem:[#allocation2 + $0x8] sm:$0xff]  ;;  %v428_v9 = vld [vmem:[#allocation2] sm:$0xff] }
  0x15   : > { %809 = vmatprep.subr.mxu0 %v433_v4 }
  0x16   : > { %810 = vmatpush3.msra.mxu0 %v433_v4 }
  0x17   : > { %811 = vmatprep.subr.mxu0 %v432_v5 }
  0x18   : > { %812 = vmatpush3.msra.mxu0 %v432_v5 }
  0x19   : > { %814 = vmatmul.mubr.msk.f32.vlgmr.msra.gmra.mxu0 %vm425_vm0, %v431_v6 }
  0xd9   : > { %v815_v8 = vpop.f32.mrf.mxu0 }
  0xda   : > { %v519_v10 = vadd.f32 %v815_v8, %v429_v7  ;;  %526 = sbr.rel (!%p522_p5) target bundleno = 363 (0x16b), region = 48 }
  0xdb   : > { %v509_v11 = vpop.f32.mrf.mxu0 }
  0xdc   : > { %521 = vst.msk [vmem:[#allocation2 + $0x8] sm:$0xff] %vm425_vm0, %v519_v10  ;;  %v518_v12 = vadd.f32 %v509_v11, %v428_v9 }
  0xde   : > { %520 = vst.msk [vmem:[#allocation2] sm:$0xff] %vm425_vm0, %v518_v12 }
  0xe3   : > { %v528_v16 = vld [vmem:[#allocation2 + $0x8] sm:$0xff] }
  0xe4   : > { %v537_v17 = vadd.f32 %v790_v14, %v528_v16 }
  0xe5   : > { %v527_v13 = vld [vmem:[#allocation2] sm:$0xff] }
  0xe6   : > { %v536_v15 = vadd.f32 %v790_v14, %v527_v13  ;;  %v576_v40 = vmul.f32 %v574_v33, %v537_v17 }
  0xe8   : > { %546 = vrot.lane.b32.xlu1 %v536_v15, %s868_s13  ;;  %540 = vrot.lane.b32.xlu0 %v536_v15, %s869_s14  ;;  %v575_v30 = vmul.f32 %v573_v22, %v536_v15 }
  0xec   : > { %548 = vrot.lane.b32.xlu1 %v537_v17, %s868_s13  ;;  %542 = vrot.lane.b32.xlu0 %v537_v17, %s869_s14 }
 0x15a   : > { %v547_v18 = vpop.permute.xlu1 %546  ;;  %v541_v19 = vpop.permute.xlu0 %540 }
 0x15b   : > { %v553_v20 = vsel %vm552_vm1, %v541_v19, %v547_v18 }
 0x15c   : > { %v556_v21 = vsel %vm555_vm2, %v553_v20, %v541_v19 }
 0x15d   : > { %v559_v23 = vsel %vm558_vm3, %v556_v21, %v547_v18 }
 0x15e   : > { %v562_v24 = vsel %vm561_vm4, %v559_v23, %v541_v19  ;;  %v549_v25 = vpop.permute.xlu1 %548  ;;  %v543_v26 = vpop.permute.xlu0 %542 }
 0x15f   : > { %v565_v28 = vsel %vm564_vm5, %v562_v24, %v547_v18  ;;  %v554_v29 = vsel %vm552_vm1, %v543_v26, %v549_v25 }
 0x160   : > { %v568_v31 = vsel %vm567_vm6, %v565_v28, %v541_v19  ;;  %v557_v32 = vsel %vm555_vm2, %v554_v29, %v543_v26 }
 0x161   : > { %v571_v34 = vsel %vm570_vm7, %v568_v31, %v547_v18  ;;  %v560_v35 = vsel %vm558_vm3, %v557_v32, %v549_v25 }
 0x162   : > { %v579_v36 = vmul.f32 %v577_v27, %v571_v34  ;;  %v563_v37 = vsel %vm561_vm4, %v560_v35, %v543_v26 }
 0x163   : > { %v566_v39 = vsel %vm564_vm5, %v563_v37, %v549_v25 }
 0x164   : > { %v581_v41 = vadd.f32 %v579_v36, %v575_v30  ;;  %v569_v42 = vsel %vm567_vm6, %v566_v39, %v543_v26 }
 0x165   : > { %v572_v43 = vsel %vm570_vm7, %v569_v42, %v549_v25 }
 0x166   : > { %583 = vst.msk [vmem:[%s939_s10] sm:$0xff] %vm425_vm0, %v581_v41  ;;  %v580_v44 = vmul.f32 %v578_v38, %v572_v43 }
 0x168   : > { %v582_v45 = vadd.f32 %v580_v44, %v576_v40 }
 0x16a   : > { %584 = vst.msk [vmem:[%s939_s10 + $0x8] sm:$0xff] %vm425_vm0, %v582_v45 }
 0x16b PF: > { %p585_p6 = scmp.eq.s32.totalorder %s857_s18, 2 }
 0x16c   : > { %v792_v47 = vld [vmem:[%s931_s28] ss:$0 sm:$0xff] (%p585_p6) }
 0x16d   : > { %589 = sbr.rel (!%p585_p6) target bundleno = 373 (0x175), region = 52 }
 0x16f   : > { %v591_v48 = vld [vmem:[#allocation2 + $0x8] sm:$0xff] (%p585_p6) }
 0x170   : > { %v600_v50 = vadd.f32 (%p585_p6), %v792_v47, %v591_v48 }
 0x171   : > { %v590_v46 = vld [vmem:[#allocation2] sm:$0xff] (%p585_p6) }
 0x172   : > { %v599_v49 = vadd.f32 %v792_v47, %v590_v46  ;;  %602 = vst.msk [vmem:[%s939_s10 + $0x8] sm:$0xff] %vm425_vm0, %v600_v50 }
 0x174   : > { %601 = vst.msk [vmem:[%s939_s10] sm:$0xff] %vm425_vm0, %v599_v49 }
 0x175 PF: > { %s15_s20 = sadd.s32 1, %s865_s20   ;;  %s1000_s18 = smov %s861_s19 }
 0x176   : > { %p12_p7 = scmp.ge.s32.totalorder %s15_s20, 5   ;;  %s1001_s19 = smov %s1003_s21 }
 0x178   :  { %14 = sbr.rel (!%p12_p7) target bundleno = 2 (0x2), region = 94 }

// kernel: multi_headed_attention.5
= control target key start
LH: loop header
LB: loop body
LE: loop exit
PB: predicated region body
PF: predicated region fallthrough
CT: control target
= control target key end

     0   :  { %vm19_vm0 = vcmask 261120   ;;  %v194_v3 = vmov 0.0   ;;  %s250_s0 = inlined_call_operand.vmem [shape: f32[16,32], index: 0, kind: input, shape index: {}]   ;;  %s251_s1 = inlined_call_operand.vmem [shape: f32[32,32], index: 1, kind: input, shape index: {}]   ;;  %s252_s2 = inlined_call_operand.vmem [shape: f32[1,32], index: 2, kind: input, shape index: {}]   ;;  %s253_s3 = inlined_call_operand.hbm [shape: f32[16,32], index: 3, kind: output, shape index: {}]  }
   0x1   :  { %v29_v0 = vld [vmem:[%s251_s1 + $0x18] sm:$0xff]  ;;  %v28_v1 = vld [vmem:[%s251_s1 + $0x10] sm:$0xff]  ;;  %v24_v2 = vld [vmem:[%s250_s0] sm:$0xff]  ;;  %21 = vst.msk [vmem:[#allocation2 + $0x8] sm:$0xff] %vm19_vm0, %v194_v3 }
   0x2   :  { %157 = vmatprep.subr.mxu0 %v29_v0  ;;  %20 = vst.msk [vmem:[#allocation2] sm:$0xff] %vm19_vm0, %v194_v3  ;;  %v27_v4 = vld [vmem:[%s251_s1 + $0x8] sm:$0xff]  ;;  %165 = vmatprep.mubr.msk.f32.mxu0 %vm19_vm0, %v24_v2 }
   0x3   :  { %158 = vmatpush3.msra.mxu0 %v29_v0 }
   0x4   :  { %8 = vsyncpa [#allocation4], 0  ;;  %159 = vmatprep.subr.mxu0 %v28_v1  ;;  %v26_v5 = vld [vmem:[%s251_s1] sm:$0xff]  ;;  %v25_v6 = vld [vmem:[%s250_s0 + $0x8] sm:$0xff]  ;;  %s195_s25 = smov [#allocation3]  }
   0x5   :  { %160 = vmatpush3.msra.mxu0 %v28_v1  ;;  %v150_v13 = vld [vmem:[%s252_s2] ss:$0 sm:$0xff]  ;;  %s137_s0 = sshll.u32 %s195_s25, 4  ;;  %s138_s0 = int_to_ptr.vmem [resolvable:$true] %s137_s0 }
   0x6   :  { %161 = vmatprep.subr.mxu0 %v27_v4  ;;  %s172_s26 = scalar_lea.vmem %s138_s0, 256  ;;  %p177_p1 = scmp.lt.s32.totalorder %s138_s0, %s138_s0 }
   0x7   :  { %162 = vmatpush3.msra.mxu0 %v27_v4  ;;  %p173_p0 = scmp.ne.s32.totalorder %s138_s0, %s172_s26  ;;  %p178_p2 = scmp.lt.s32.totalorder %s172_s26, %s172_s26 }
   0x8   :  { %163 = vmatprep.subr.mxu0 %v26_v5  ;;  %v23_v7 = vld [vmem:[#allocation2 + $0x8] sm:$0xff] }
   0x9   :  { %164 = vmatpush3.msra.mxu0 %v26_v5  ;;  %v22_v9 = vld [vmem:[#allocation2] sm:$0xff]  ;;  %p179_p3 = por %p178_p2, %p177_p1 }
   0xa   :  { %166 = vmatmul.mubr.msk.f32.vlgmr.msra.gmra.mxu0 %vm19_vm0, %v25_v6 }
   0xb   :  { %p180_p4 = pnand %p179_p3, %p173_p0 }
  0xca   :  { %v167_v8 = vpop.f32.mrf.mxu0 }
  0xcb   :  { %v113_v10 = vadd.f32 %v167_v8, %v23_v7 }
  0xcc   :  { %v103_v11 = vpop.f32.mrf.mxu0 }
  0xcd   :  { %115 = vst.msk [vmem:[#allocation2 + $0x8] sm:$0xff] %vm19_vm0, %v113_v10  ;;  %v112_v12 = vadd.f32 %v103_v11, %v22_v9 }
  0xcf   :  { %114 = vst.msk [vmem:[#allocation2] sm:$0xff] %vm19_vm0, %v112_v12 }
  0xd4   :  { %v120_v14 = vld [vmem:[#allocation2 + $0x8] sm:$0xff] }
  0xd5   :  { %v129_v15 = vadd.f32 %v150_v13, %v120_v14 }
  0xd6   :  { %v119_v16 = vld [vmem:[#allocation2] sm:$0xff] }
  0xd7   :  { %v128_v17 = vadd.f32 %v150_v13, %v119_v16  ;;  %131 = vst.msk [vmem:[#allocation3 + $0x8] sm:$0xff] %vm19_vm0, %v129_v15 }
  0xd9   :  { %130 = vst.msk [vmem:[#allocation3] sm:$0xff] %vm19_vm0, %v128_v17 }
  0xda   :  { %183 = shalt.err (!%p180_p4)
}
  0xdb   :  { %s196_s27 = smov 128   ;;  %s197_s2 = smov 8  }
  0xdc   :  { %143 = dma.vmem_to_hbm [thread:$0]  %s138_s0, 256, %s253_s3, [#allocation4], %s196_s27, %s196_s27, %s197_s2  }
  0xdd   :  { %192 = dma.done.wait [#allocation4], 256  }
  0xde   :  { %193 = vsyncadd [#allocation4], 4294967040 }
  0xdf   :  { %147 = vsyncpa [#allocation4], 1 }

// kernel: multi_headed_attention.4
= control target key start
LH: loop header
LB: loop body
LE: loop exit
PB: predicated region body
PF: predicated region fallthrough
CT: control target
= control target key end

     0   :  { %s1408_s12 = smov 0   ;;  %s1410_s13 = smov 0   ;;  %s1554_s0 = inlined_call_operand.vmem [shape: f32[3,2,8,32], index: 0, kind: input, shape index: {}, may-alias: {0,1,2}]   ;;  %s1555_s1 = inlined_call_operand.vmem [shape: f32[3,2,8,32], index: 1, kind: input, shape index: {}, may-alias: {0,1,2}]   ;;  %s1556_s2 = inlined_call_operand.vmem [shape: f32[3,2,8,32], index: 2, kind: input, shape index: {}, may-alias: {0,1,2}]   ;;  %s1557_s3 = inlined_call_operand.vmem [shape: f32[2,8,32], index: 3, kind: output, shape index: {}]  }
   0x1   :  { %s1412_s14 = smov 0  }
   0x2 LB: > { %s32_s15 = sadd.s32 1, %s1372_s13  ;;  %p1217_p0 = scmp.ge.s32.totalorder %s1376_s14, 1  ;;  %s1376_s14 = sphi %s1412_s14, %s13_s14   ;;  %s1372_s13 = sphi %s1410_s13, %s1559_s13   ;;  %s1368_s12 = sphi %s1408_s12, %s1558_s12  }
   0x3   : > { %p34_p1 = scmp.ge.s32.totalorder %s32_s15, 2  ;;  %p192_p2 = scmp.lt.s32.totalorder %s1376_s14, 3 }
   0x5   : > { %s1561_s15 = smov (%p34_p1, %s32_s15), 0  ;;  %p193_p3 = pnand %p1217_p0, %p192_p2 }
   0x6   : > { %p236_p4 = scmp.lt.s32.totalorder (!%p193_p3), %s1368_s12, 1  ;;  %s1382_s23 = smov (!%p193_p3), 120  }
   0x7   : > { %196 = sbr.rel (%p193_p3) target bundleno = 1389 (0x56d), region = 32  ;;  %s1383_s24 = smov (!%p193_p3), 112  }
   0x8   : > { %s1384_s25 = smov (!%p193_p3), 104   ;;  %s1385_s29 = smov (!%p193_p3), 8  }
   0x9   : > { %s1386_s30 = smov (!%p193_p3), 16   ;;  %s1387_s4 = smov (!%p193_p3), 24  }
   0xc   : > { %vm270_vm0 = vcmask 64512   ;;  %v1378_v0 = vmov 0.0   ;;  %vm1379_vm1 = vmmov 0   ;;  %s1563_s12 = smov (!%p236_p4, %s1368_s12), 1  ;;  %vm275_vm2 = vcmask 7168  }
   0xd   : > { %1254 = vmatprep.subr.mxu0 %v1378_v0  ;;  %271 = vst.msk [vmem:[#allocation2] sm:$0xff] %vm270_vm0, %v1378_v0  ;;  %272 = vst.msk [vmem:[#allocation2 + $0x8] sm:$0xff] %vm270_vm0, %v1378_v0  ;;  %1256 = vmatprep.mubr.msk.f32.mxu0 %vm1379_vm1, %v1378_v0  ;;  %s1440_s16 = sshll.u32 %s1563_s12, 3  ;;  %v1380_v3 = vmov -inf   ;;  %v1381_v7 = vmov 0   ;;  %vm1094_vm3 = vcmask 130048  }
   0xe   : > { %273 = vst.msk [vmem:[#allocation2 + $0x10] sm:$0xff] %vm270_vm0, %v1378_v0  ;;  %274 = vst.msk [vmem:[#allocation2 + $0x18] sm:$0xff] %vm270_vm0, %v1378_v0  ;;  %1259 = vmatprep.subr.mxu1 %v1378_v0  ;;  %1261 = vmatprep.mubr.msk.f32.mxu1 %vm1379_vm1, %v1378_v0  ;;  %s1155_s19 = scalar_lea.vmem %s1555_s1, %s1440_s16  ;;  %s242_s22 = scalar_lea.vmem %s1554_s0, %s1440_s16  ;;  %vm1096_vm4 = vcmask 195584   ;;  %vm1098_vm5 = vcmask 261120  }
   0xf   : > { %v1222_v1 = vld [vmem:[%s1155_s19 + $0x10] sm:$0xff]  ;;  %v284_v2 = vld [vmem:[%s242_s22] sm:$0xff]  ;;  %276 = vst.msk [vmem:[#allocation3] sm:$0xff] %vm275_vm2, %v1380_v3  ;;  %277 = vst.msk [vmem:[#allocation3 + $0x8] sm:$0xff] %vm275_vm2, %v1380_v3  ;;  %1328 = vset.pattern.permute.xlu0 %v1381_v7  ;;  %1329 = vset.pattern.permute.xlu1 %v1381_v7  ;;  %s1159_s28 = scalar_lea.vmem %s1556_s2, %s1440_s16  ;;  %s265_s7 = scalar_lea.vmem %s1557_s3, %s1440_s16 }
  0x10   : > { %1255 = vmatpush3.xpose.msk.msra.mxu0 %vm270_vm0, %v1222_v1  ;;  %278 = vst.msk [vmem:[#allocation3 + $0x10] sm:$0xff] %vm275_vm2, %v1380_v3  ;;  %279 = vst.msk [vmem:[#allocation3 + $0x18] sm:$0xff] %vm275_vm2, %v1380_v3  ;;  %473 = vrot.lane.b32.xlu1 %v1222_v1, %s1382_s23  ;;  %v1223_v12 = vld [vmem:[%s1159_s28 + $0x20] sm:$0xff] }
  0x11   : > { %1269 = vmatprep.subr.mxu0 %v1378_v0  ;;  %280 = vst.msk [vmem:[#allocation4] sm:$0xff] %vm275_vm2, %v1378_v0  ;;  %281 = vst.msk [vmem:[#allocation4 + $0x8] sm:$0xff] %vm275_vm2, %v1378_v0  ;;  %1260 = vmatpush3.msra.mxu1 %v1223_v12 }
  0x12   : > { %282 = vst.msk [vmem:[#allocation4 + $0x10] sm:$0xff] %vm275_vm2, %v1378_v0  ;;  %283 = vst.msk [vmem:[#allocation4 + $0x18] sm:$0xff] %vm275_vm2, %v1378_v0  ;;  %1264 = vmatprep.subr.mxu1 %v1378_v0 }
  0x13   : > { %1257 = vmatmul.mubr.msk.f32.vlgmr.msra.gmra.mxu0 %vm270_vm0, %v284_v2 }
  0x14   : > { %1271 = vmatprep.mubr.msk.f32.mxu0 %vm1379_vm1, %v1378_v0  ;;  %471 = vrot.lane.b32.xlu1 %v284_v2, %s1382_s23 }
  0x16   : > { %v1474_v8 = vld [vmem:[#allocation3] sm:$0xff]  ;;  %v550_v34 = vld [vmem:[#allocation3 + $0x8] sm:$0xff] }
  0x17   : > { %v741_v37 = vld [vmem:[#allocation3 + $0x10] sm:$0xff]  ;;  %v931_v41 = vld [vmem:[#allocation3 + $0x18] sm:$0xff] }
  0x18   : > { %664 = vrot.lane.b32.xlu1 %v1222_v1, %s1383_s24 }
  0x1c   : > { %662 = vrot.lane.b32.xlu1 %v284_v2, %s1383_s24 }
  0x20   : > { %854 = vrot.lane.b32.xlu1 %v1222_v1, %s1384_s25 }
  0x24   : > { %852 = vrot.lane.b32.xlu1 %v284_v2, %s1384_s25 }
  0x82   : > { %v474_v13 = vpop.permute.xlu1 %473 }
  0x86   : > { %v472_v17 = vpop.permute.xlu1 %471 }
  0x8a   : > { %v665_v18 = vpop.permute.xlu1 %664 }
  0x8e   : > { %v663_v19 = vpop.permute.xlu1 %662 }
  0x92   : > { %v855_v21 = vpop.permute.xlu1 %854 }
  0x96   : > { %v853_v22 = vpop.permute.xlu1 %852 }
  0xd3   : > { %v360_v4 = vpop.f32.mrf.mxu0 }
  0xd4   : > { %v366_v5 = vsel %vm270_vm0, %v360_v4, -inf }
  0xd5   : > { %367 = vmax.xlane.f32.xlu0 %v366_v5  ;;  %v1258_v6 = vpop.f32.mrf.mxu0 }
 0x15e   : > { %v368_v9 = vpop.xlane.xlu0 %367 }
 0x15f   : > { %v1477_v10 = vmax.f32 %v1474_v8, %v368_v9 }
 0x161   : > { %v370_v11 = vsub.f32 %v1474_v8, %v1477_v10  ;;  %388 = vst.msk [vmem:[#allocation3] sm:$0xff] %vm275_vm2, %v1477_v10  ;;  %375 = vperm.xlu0 %1328, %v1477_v10   ;;  %v552_v8 = vld [vmem:[#allocation4 + $0x8] sm:$0xff] }
 0x1dc   : > { %v376_v14 = vpop.permute.xlu0 %375 }
 0x1dd   : > { %v378_v15 = vsub.f32 %v360_v4, %v376_v14  ;;  %v371_v4 = vmul.f32 1.442695, %v370_v11 }
 0x1df   : > { %v379_v16 = vmul.f32 1.442695, %v378_v15 }
 0x1e1   : > { %1330 = vpow2.f32 %v379_v16 }
 0x1ee   : > { %v1331_v20 = vpop.eup %1330 }
 0x1ef   : > { %1262 = vmatmul.mubr.msk.f32.vlgmr.msra.gmra.mxu1 %vm270_vm0, %v1331_v20  ;;  %v382_v46 = vsel %vm270_vm0, %v1331_v20, 0.0 }
 0x1f0   : > { %1265 = vmatpush3.xpose.msk.msra.mxu1 %vm270_vm0, %v474_v13  ;;  %1266 = vmatprep.mubr.msk.f32.mxu1 %vm1379_vm1, %v1378_v0 }
 0x1f1   : > { %1274 = vmatprep.subr.mxu1 %v1378_v0 }
 0x1f3   : > { %1267 = vmatmul.mubr.msk.f32.vlgmr.msra.gmra.mxu1 %vm270_vm0, %v472_v17  ;;  %v743_v17 = vld [vmem:[#allocation4 + $0x10] sm:$0xff] }
 0x1f4   : > { %1275 = vmatpush3.xpose.msk.msra.mxu1 %vm270_vm0, %v665_v18  ;;  %1276 = vmatprep.mubr.msk.f32.mxu1 %vm1379_vm1, %v1378_v0 }
 0x1f5   : > { %1284 = vmatprep.subr.mxu1 %v1378_v0 }
 0x1f7   : > { %1277 = vmatmul.mubr.msk.f32.vlgmr.msra.gmra.mxu1 %vm270_vm0, %v663_v19 }
 0x1f8   : > { %1285 = vmatpush3.xpose.msk.msra.mxu1 %vm270_vm0, %v855_v21  ;;  %1286 = vmatprep.mubr.msk.f32.mxu1 %vm1379_vm1, %v1378_v0  ;;  %v933_v21 = vld [vmem:[#allocation4 + $0x18] sm:$0xff] }
 0x1fb   : > { %1287 = vmatmul.mubr.msk.f32.vlgmr.msra.gmra.mxu1 %vm270_vm0, %v853_v22 }
 0x2af   : > { %v1504_v23 = vpop.f32.mrf.mxu1 }
 0x2b1   : > { %v1263_v24 = vpop.f32.mrf.mxu1 }
 0x2b3   : > { %v545_v25 = vpop.f32.mrf.mxu1 }
 0x2b4   : > { %v553_v26 = vsel %vm270_vm0, %v545_v25, -inf }
 0x2b5   : > { %554 = vmax.xlane.f32.xlu1 %v553_v26  ;;  %v1268_v27 = vpop.f32.mrf.mxu1 }
 0x2b7   : > { %v736_v28 = vpop.f32.mrf.mxu1 }
 0x2b8   : > { %v744_v29 = vsel %vm270_vm0, %v736_v28, -inf }
 0x2b9   : > { %745 = vmax.xlane.f32.xlu0 %v744_v29  ;;  %v1278_v30 = vpop.f32.mrf.mxu1  ;;  %v389_v29 = vld [vmem:[#allocation2] sm:$0xff] }
 0x2bb   : > { %v926_v31 = vpop.f32.mrf.mxu1 }
 0x2bc   : > { %v934_v32 = vsel %vm270_vm0, %v926_v31, -inf }
 0x2bd   : > { %935 = vmax.xlane.f32.xlu1 %v934_v32  ;;  %v1288_v33 = vpop.f32.mrf.mxu1 }
 0x33e   : > { %v555_v35 = vpop.xlane.xlu1 %554 }
 0x33f   : > { %v556_v36 = vmax.f32 %v550_v34, %v555_v35 }
 0x341   : > { %v557_v38 = vsub.f32 %v550_v34, %v556_v36  ;;  %574 = vst.msk [vmem:[#allocation3 + $0x8] sm:$0xff] %vm275_vm2, %v556_v36  ;;  %562 = vperm.xlu1 %1329, %v556_v36   ;;  %v576_v34 = vld [vmem:[#allocation2 + $0x8] sm:$0xff] }
 0x342   : > { %v746_v39 = vpop.xlane.xlu0 %745 }
 0x343   : > { %v747_v40 = vmax.f32 %v741_v37, %v746_v39  ;;  %v558_v62 = vmul.f32 1.442695, %v557_v38 }
 0x345   : > { %v748_v42 = vsub.f32 %v741_v37, %v747_v40  ;;  %765 = vst.msk [vmem:[#allocation3 + $0x10] sm:$0xff] %vm275_vm2, %v747_v40  ;;  %753 = vperm.xlu0 %1328, %v747_v40   ;;  %v767_v37 = vld [vmem:[#allocation2 + $0x10] sm:$0xff] }
 0x346   : > { %v936_v43 = vpop.xlane.xlu1 %935 }
 0x347   : > { %v937_v44 = vmax.f32 %v931_v41, %v936_v43  ;;  %v749_v5 = vmul.f32 1.442695, %v748_v42  ;;  %v957_v43 = vld [vmem:[#allocation2 + $0x18] sm:$0xff] }
 0x349   : > { %v938_v45 = vsub.f32 %v931_v41, %v937_v44  ;;  %955 = vst.msk [vmem:[#allocation3 + $0x18] sm:$0xff] %vm275_vm2, %v937_v44  ;;  %943 = vperm.xlu1 %1329, %v937_v44  }
 0x34b   : > { %v939_v2 = vmul.f32 1.442695, %v938_v45 }
 0x34d   : > { %584 = vrot.lane.b32.xlu1 %v1223_v12, %s1382_s23 }
 0x351   : > { %774 = vrot.lane.b32.xlu1 %v1223_v12, %s1383_s24 }
 0x355   : > { %964 = vrot.lane.b32.xlu1 %v1223_v12, %s1384_s25  ;;  %v365_v12 = vld [vmem:[#allocation4] sm:$0xff] }
 0x379   : > { %383 = vadd.xlane.f32.xlu1 %v382_v46 }
 0x3bc   : > { %v563_v47 = vpop.permute.xlu1 %562 }
 0x3bd   : > { %v565_v48 = vsub.f32 %v545_v25, %v563_v47 }
 0x3bf   : > { %v566_v49 = vmul.f32 1.442695, %v565_v48 }
 0x3c0   : > { %v754_v50 = vpop.permute.xlu0 %753 }
 0x3c1   : > { %1332 = vpow2.f32 %v566_v49  ;;  %v756_v51 = vsub.f32 %v736_v28, %v754_v50 }
 0x3c3   : > { %v757_v52 = vmul.f32 1.442695, %v756_v51 }
 0x3c4   : > { %v944_v53 = vpop.permute.xlu1 %943 }
 0x3c5   : > { %1334 = vpow2.f32 %v757_v52  ;;  %v946_v54 = vsub.f32 %v926_v31, %v944_v53 }
 0x3c7   : > { %v947_v55 = vmul.f32 1.442695, %v946_v54 }
 0x3c8   : > { %v585_v56 = vpop.permute.xlu1 %584 }
 0x3c9   : > { %1336 = vpow2.f32 %v947_v55  ;;  %1270 = vmatpush3.msra.mxu0 %v585_v56 }
 0x3ca   : > { %1279 = vmatprep.subr.mxu0 %v1378_v0  ;;  %1338 = vpow2.f32 %v558_v62 }
 0x3cb   : > { %1340 = vpow2.f32 %v939_v2 }
 0x3cc   : > { %v775_v57 = vpop.permute.xlu1 %774  ;;  %1342 = vpow2.f32 %v371_v4 }
 0x3cd   : > { %1344 = vpow2.f32 %v749_v5 }
 0x3ce   : > { %v1333_v58 = vpop.eup %1332 }
 0x3cf   : > { %1272 = vmatmul.mubr.msk.f32.vlgmr.msra.gmra.mxu0 %vm270_vm0, %v1333_v58  ;;  %v569_v59 = vsel %vm270_vm0, %v1333_v58, 0.0 }
 0x3d0   : > { %570 = vadd.xlane.f32.xlu0 %v569_v59  ;;  %1280 = vmatpush3.msra.mxu0 %v775_v57  ;;  %v965_v60 = vpop.permute.xlu1 %964 }
 0x3d1   : > { %1281 = vmatprep.mubr.msk.f32.mxu0 %vm1379_vm1, %v1378_v0  ;;  %1289 = vmatprep.subr.mxu0 %v1378_v0 }
 0x3d2   : > { %v1335_v61 = vpop.eup %1334 }
 0x3d3   : > { %1282 = vmatmul.mubr.msk.f32.vlgmr.msra.gmra.mxu0 %vm270_vm0, %v1335_v61  ;;  %v760_v63 = vsel %vm270_vm0, %v1335_v61, 0.0 }
 0x3d4   : > { %761 = vadd.xlane.f32.xlu1 %v760_v63  ;;  %1290 = vmatpush3.msra.mxu0 %v965_v60 }
 0x3d5   : > { %1291 = vmatprep.mubr.msk.f32.mxu0 %vm1379_vm1, %v1378_v0 }
 0x3d6   : > { %v1337_v1 = vpop.eup %1336 }
 0x3d7   : > { %1292 = vmatmul.mubr.msk.f32.vlgmr.msra.gmra.mxu0 %vm270_vm0, %v1337_v1  ;;  %v950_v3 = vsel %vm270_vm0, %v1337_v1, 0.0  ;;  %v1339_v6 = vpop.eup %1338 }
 0x3d8   : > { %951 = vadd.xlane.f32.xlu0 %v950_v3  ;;  %v1341_v7 = vpop.eup %1340  ;;  %v568_v10 = vmul.f32 %v1339_v6, %v552_v8 }
 0x3d9   : > { %v1343_v0 = vpop.eup %1342  ;;  %v949_v24 = vmul.f32 %v1341_v7, %v933_v21 }
 0x3da   : > { %v1345_v9 = vpop.eup %1344  ;;  %v381_v13 = vmul.f32 %v1343_v0, %v365_v12 }
 0x3db   : > { %v759_v19 = vmul.f32 %v1345_v9, %v743_v17 }
 0x3e5   : > { %579 = vperm.xlu1 %1329, %v1339_v6  }
 0x3e9   : > { %960 = vperm.xlu1 %1329, %v1341_v7  }
 0x3ee   : > { %392 = vperm.xlu0 %1328, %v1343_v0  }
 0x3f2   : > { %770 = vperm.xlu0 %1328, %v1345_v9  }
 0x402   : > { %v384_v14 = vpop.xlane.xlu1 %383 }
 0x403   : > { %v385_v15 = vadd.f32 %v384_v14, %v381_v13 }
 0x405   : > { %387 = vst.msk [vmem:[#allocation4] sm:$0xff] %vm275_vm2, %v385_v15 }
 0x40c   : > { %v1046_v16 = vld [vmem:[#allocation4] sm:$0xff] }
 0x40d   : > { %1049 = vperm.xlu1 %1329, %v1046_v16  }
 0x459   : > { %v571_v11 = vpop.xlane.xlu0 %570 }
 0x45a   : > { %v572_v18 = vadd.f32 %v571_v11, %v568_v10 }
 0x45c   : > { %573 = vst.msk [vmem:[#allocation4 + $0x8] sm:$0xff] %vm275_vm2, %v572_v18 }
 0x45d   : > { %v762_v20 = vpop.xlane.xlu1 %761 }
 0x45e   : > { %v763_v22 = vadd.f32 %v762_v20, %v759_v19 }
 0x460   : > { %764 = vst.msk [vmem:[#allocation4 + $0x10] sm:$0xff] %vm275_vm2, %v763_v22 }
 0x461   : > { %v952_v25 = vpop.xlane.xlu0 %951  ;;  %v580_v35 = vpop.permute.xlu1 %579 }
 0x462   : > { %v953_v26 = vadd.f32 %v952_v25, %v949_v24  ;;  %v582_v36 = vmul.f32 %v580_v35, %v576_v34 }
 0x463   : > { %v1055_v27 = vld [vmem:[#allocation4 + $0x8] sm:$0xff] }
 0x464   : > { %954 = vst.msk [vmem:[#allocation4 + $0x18] sm:$0xff] %vm275_vm2, %v953_v26  ;;  %1058 = vperm.xlu0 %1328, %v1055_v27  }
 0x465   : > { %v961_v44 = vpop.permute.xlu1 %960 }
 0x467   : > { %v1064_v28 = vld [vmem:[#allocation4 + $0x10] sm:$0xff] }
 0x468   : > { %1067 = vperm.xlu1 %1329, %v1064_v28  }
 0x469   : > { %v393_v30 = vpop.permute.xlu0 %392 }
 0x46a   : > { %v395_v31 = vmul.f32 %v393_v30, %v389_v29 }
 0x46b   : > { %v1073_v32 = vld [vmem:[#allocation4 + $0x18] sm:$0xff] }
 0x46c   : > { %v469_v33 = vadd.f32 %v1504_v23, %v395_v31  ;;  %1076 = vperm.xlu0 %1328, %v1073_v32   ;;  %v963_v23 = vmul.f32 %v961_v44, %v957_v43 }
 0x46d   : > { %v771_v38 = vpop.permute.xlu0 %770 }
 0x46e   : > { %470 = vst.msk [vmem:[#allocation2] sm:$0xff] %vm270_vm0, %v469_v33  ;;  %v773_v42 = vmul.f32 %v771_v38, %v767_v37 }
 0x475   : > { %v1045_v2 = vld [vmem:[#allocation2] sm:$0xff] }
 0x488   : > { %v1050_v51 = vpop.permute.xlu1 %1049 }
 0x48f   : > { %v656_v39 = vpop.f32.mrf.mxu0 }
 0x490   : > { %v660_v40 = vadd.f32 %v656_v39, %v582_v36 }
 0x491   : > { %v1273_v41 = vpop.f32.mrf.mxu0 }
 0x492   : > { %661 = vst.msk [vmem:[#allocation2 + $0x8] sm:$0xff] %vm270_vm0, %v660_v40 }
 0x493   : > { %v846_v45 = vpop.f32.mrf.mxu0 }
 0x494   : > { %v850_v46 = vadd.f32 %v846_v45, %v773_v42 }
 0x495   : > { %v1283_v47 = vpop.f32.mrf.mxu0 }
 0x496   : > { %851 = vst.msk [vmem:[#allocation2 + $0x10] sm:$0xff] %vm270_vm0, %v850_v46 }
 0x497   : > { %v1036_v48 = vpop.f32.mrf.mxu0 }
 0x498   : > { %v1040_v49 = vadd.f32 %v1036_v48, %v963_v23 }
 0x499   : > { %v1293_v50 = vpop.f32.mrf.mxu0  ;;  %v1054_v56 = vld [vmem:[#allocation2 + $0x8] sm:$0xff] }
 0x49a   : > { %1041 = vst.msk [vmem:[#allocation2 + $0x18] sm:$0xff] %vm270_vm0, %v1040_v49 }
 0x49d   : > { %v1063_v59 = vld [vmem:[#allocation2 + $0x10] sm:$0xff] }
 0x4a1   : > { %v1072_v62 = vld [vmem:[#allocation2 + $0x18] sm:$0xff] }
 0x4df   : > { %v1059_v52 = vpop.permute.xlu0 %1058 }
 0x4e0   : > { %1346 = vrcp.f32 %v1059_v52 }
 0x4e3   : > { %v1068_v53 = vpop.permute.xlu1 %1067 }
 0x4e4   : > { %1348 = vrcp.f32 %v1068_v53 }
 0x4e7   : > { %v1077_v54 = vpop.permute.xlu0 %1076 }
 0x4e8   : > { %1350 = vrcp.f32 %v1077_v54 }
 0x4e9   : > { %1352 = vrcp.f32 %v1050_v51 }
 0x4ed   : > { %v1347_v55 = vpop.eup %1346 }
 0x4ee   : > { %v1062_v57 = vmul.f32 %v1347_v55, %v1054_v56 }
 0x4f0   : > { %1082 = vrot.lane.b32.xlu1 %v1062_v57, %s1385_s29 }
 0x4f1   : > { %v1349_v58 = vpop.eup %1348 }
 0x4f2   : > { %v1071_v60 = vmul.f32 %v1349_v58, %v1063_v59 }
 0x4f4   : > { %1086 = vrot.lane.b32.xlu0 %v1071_v60, %s1386_s30 }
 0x4f5   : > { %v1351_v61 = vpop.eup %1350 }
 0x4f6   : > { %v1080_v63 = vmul.f32 %v1351_v61, %v1072_v62  ;;  %v1353_v1 = vpop.eup %1352 }
 0x4f7   : > { %v1053_v4 = vmul.f32 %v1353_v1, %v1045_v2 }
 0x4f8   : > { %1090 = vrot.lane.b32.xlu1 %v1080_v63, %s1387_s4 }
 0x562   : > { %v1083_v3 = vpop.permute.xlu1 %1082 }
 0x563   : > { %v1093_v6 = vsel %vm270_vm0, %v1053_v4, %v1083_v3 }
 0x566   : > { %v1087_v5 = vpop.permute.xlu0 %1086 }
 0x567   : > { %v1095_v7 = vsel %vm1094_vm3, %v1093_v6, %v1087_v5 }
 0x56a   : > { %v1091_v0 = vpop.permute.xlu1 %1090 }
 0x56b   : > { %v1097_v9 = vsel %vm1096_vm4, %v1095_v7, %v1091_v0 }
 0x56c   : > { %1099 = vst.msk [vmem:[%s265_s7] sm:$0xff] %vm1098_vm5, %v1097_v9 }
 0x56d PF: > { %s13_s14 = sadd.s32 1, %s1376_s14   ;;  %s1558_s12 = smov %s1372_s13 }
 0x56e   : > { %p10_p5 = scmp.ge.s32.totalorder %s13_s14, 4   ;;  %s1559_s13 = smov %s1561_s15 }
 0x570   :  { %12 = sbr.rel (!%p10_p5) target bundleno = 2 (0x2), region = 85 }

</bundles_post_ra>
